<compile_context>
chip_gen: v7x
topology: tpu7x:2x2x1
jax: 0.10.0
libtpu: 0.0.40
codegen_flags: <defaults>
</compile_context>

<pallas_src>
import functools

import jax
import jax.numpy as jnp
from jax.experimental import pallas as pl
from jax.experimental.pallas import tpu as pltpu


# ----------------------------------------------------------------------------
# Fused kernel: one block of batch elements per grid step.
# ----------------------------------------------------------------------------
def _mha_fused_kernel(num_heads,
                      q_ref, k_ref, v_ref,
                      wq_ref, wk_ref, wv_ref,
                      bq_ref, bk_ref, bv_ref,
                      wo_ref, bo_ref,
                      z_ref, w_ref,
                      o_buf):
    # Shapes (per grid step):
    #   q_ref: (Bb, tgt, E)      k_ref/v_ref: (Bb, src, E)
    #   wq/wk/wv/wo: (E, E)  (input-major; scaling folded into wq)
    #   bq/bk/bv/bo: (1, E)
    #   z_ref: (Bb, tgt, E)      w_ref: (Bb, tgt, src)
    #   o_buf (VMEM scratch, f32): (Bb, tgt, E)
    bb, tgt, embed_dim = q_ref.shape
    src = k_ref.shape[1]
    head_dim = embed_dim // num_heads
    io_dtype = q_ref.dtype

    # ---- Fused Q/K/V projections: ONE (M, E) @ (E, E) matmul each. ---------
    xq = q_ref[...].reshape(bb * tgt, embed_dim)
    xk = k_ref[...].reshape(bb * src, embed_dim)
    xv = v_ref[...].reshape(bb * src, embed_dim)

    q = jnp.dot(xq, wq_ref[...], preferred_element_type=jnp.float32) + bq_ref[...]
    k = jnp.dot(xk, wk_ref[...], preferred_element_type=jnp.float32) + bk_ref[...]
    v = jnp.dot(xv, wv_ref[...], preferred_element_type=jnp.float32) + bv_ref[...]

    # Keep MXU operands in the I/O dtype (bf16-native when inputs are bf16);
    # all accumulation stays f32 via preferred_element_type.
    q = q.astype(io_dtype).reshape(bb, tgt, embed_dim)
    k = k.astype(io_dtype).reshape(bb, src, embed_dim)
    v = v.astype(io_dtype).reshape(bb, src, embed_dim)

    # ---- Per-head attention core (head_dim contraction is inherently small).
    # NOTE: for large num_heads, move heads onto a grid axis with VMEM
    # accumulators; at H=4 a static unroll keeps everything in registers.
    w_acc = jnp.zeros((bb, tgt, src), jnp.float32)
    for h in range(num_heads):
        lo = h * head_dim
        q_h = q[:, :, lo:lo + head_dim]                       # (Bb, tgt, hd)
        k_h = k[:, :, lo:lo + head_dim]                       # (Bb, src, hd)
        v_h = v[:, :, lo:lo + head_dim]                       # (Bb, src, hd)

        s = jnp.einsum("btd,bsd->bts", q_h, k_h,
                       preferred_element_type=jnp.float32)    # (Bb, tgt, src)
        # TODO(synk): attn_mask / key_padding_mask / dropout (None / p=0.0 here).

        # Numerically-stable softmax with EXACT normalization (user-visible).
        m = jnp.max(s, axis=-1, keepdims=True)
        e = jnp.exp(s - m)
        p = e / jnp.sum(e, axis=-1, keepdims=True)
        w_acc = w_acc + p                                     # head-average accum

        o_h = jnp.einsum("bts,bsd->btd", p.astype(io_dtype), v_h,
                         preferred_element_type=jnp.float32)  # (Bb, tgt, hd)
        # Lane-concatenate heads into the (Bb, tgt, E) scratch buffer.
        o_buf[:, :, lo:lo + head_dim] = o_h

    # ---- Single fused output projection: ONE (Bb*tgt, E) @ (E, E) matmul. --
    o = o_buf[...].astype(io_dtype).reshape(bb * tgt, embed_dim)
    z = jnp.dot(o, wo_ref[...], preferred_element_type=jnp.float32) + bo_ref[...]
    z_ref[...] = z.reshape(bb, tgt, embed_dim).astype(z_ref.dtype)
    w_ref[...] = (w_acc * (1.0 / num_heads)).astype(w_ref.dtype)


# ----------------------------------------------------------------------------
# One-time parameter preparation: fold scaling, pre-transpose, keep combined.
# ----------------------------------------------------------------------------
def prepare_params(params, num_heads):
    embed_dim = params["wq"].shape[0]
    head_dim = embed_dim // num_heads
    scaling = float(head_dim) ** (-0.5)
    return {
        "num_heads": num_heads,
        # PyTorch Linear: y = x @ W.T + b  ->  store W.T (in, out).
        "wq_t": (params["wq"] * scaling).T,                    # scaling folded in
        "bq_s": (params["bq"] * scaling).reshape(1, embed_dim),
        "wk_t": params["wk"].T,
        "bk": params["bk"].reshape(1, embed_dim),
        "wv_t": params["wv"].T,
        "bv": params["bv"].reshape(1, embed_dim),
        "wo_t": params["wo"].T,                                # rows = head-concat features
        "bo": params["bo"].reshape(1, embed_dim),
    }


# ----------------------------------------------------------------------------
# pallas_call builder.
# ----------------------------------------------------------------------------
def _build_mha_call(tgt_len, src_len, bsz, embed_dim, num_heads, block_b,
                    io_dtype, single_buffer_weights):
    grid_b = bsz // block_b

    def batched(tail):
        n = len(tail)
        return pl.BlockSpec((block_b,) + tail, lambda b: (b,) + (0,) * n)

    def const(shape):
        n = len(shape)
        idx = lambda b: (0,) * n
        if single_buffer_weights:
            # Constant block index -> no need to double-buffer the weights.
            return pl.BlockSpec(shape, idx, pipeline_mode=pl.Buffered(1))
        return pl.BlockSpec(shape, idx)

    kernel = functools.partial(_mha_fused_kernel, num_heads)

    return pl.pallas_call(
        kernel,
        grid=(grid_b,),
        in_specs=[
            batched((tgt_len, embed_dim)),        # q  (B, tgt, E)
            batched((src_len, embed_dim)),        # k  (B, src, E)
            batched((src_len, embed_dim)),        # v  (B, src, E)
            const((embed_dim, embed_dim)),        # wq (scaled, transposed)
            const((embed_dim, embed_dim)),        # wk
            const((embed_dim, embed_dim)),        # wv
            const((1, embed_dim)),                # bq (scaled)
            const((1, embed_dim)),                # bk
            const((1, embed_dim)),                # bv
            const((embed_dim, embed_dim)),        # wo (transposed)
            const((1, embed_dim)),                # bo
        ],
        out_specs=[
            batched((tgt_len, embed_dim)),        # z  (B, tgt, E)
            batched((tgt_len, src_len)),          # w  (B, tgt, src)
        ],
        out_shape=[
            jax.ShapeDtypeStruct((bsz, tgt_len, embed_dim), io_dtype),
            jax.ShapeDtypeStruct((bsz, tgt_len, src_len), jnp.float32),
        ],
        scratch_shapes=[pltpu.VMEM((block_b, tgt_len, embed_dim), jnp.float32)],
        compiler_params=pltpu.CompilerParams(
            dimension_semantics=("parallel",),
            # Explicit scoped-VMEM limit (v5e default is only 16 MiB); the
            # kernel itself needs only ~100 KiB at these toy shapes.
            vmem_limit_bytes=32 * 1024 * 1024,
        ),
    )


# ----------------------------------------------------------------------------
# Forward (single fused pallas_call).
# ----------------------------------------------------------------------------
def mha_forward(prep, query, key, value, *, block_b=None):
    tgt_len, bsz, embed_dim = query.shape
    src_len = key.shape[0]
    num_heads = prep["num_heads"]

    if block_b is None:
        # Default: 2 grid steps when bsz is even (keeps both v7x TensorCores
        # busy), each step processing bsz//2 elements to fill MXU rows and
        # amortize per-step overhead.  On v5e/v6e extra steps are just a loop.
        block_b = bsz // 2 if (bsz >= 2 and bsz % 2 == 0) else 1
    assert bsz % block_b == 0, "bsz must be divisible by block_b"

    # (L, B, E) -> (B, L, E): the BlockSpec (8,128) rule prevents blocking the
    # middle batch dim directly.  NOTE: for production, accept/return (B, L, E)
    # to avoid these HBM relayout passes around the fused kernel.
    q_b = jnp.swapaxes(query, 0, 1)
    k_b = jnp.swapaxes(key, 0, 1)
    v_b = jnp.swapaxes(value, 0, 1)

    args = (q_b, k_b, v_b,
            prep["wq_t"], prep["wk_t"], prep["wv_t"],
            prep["bq_s"], prep["bk"], prep["bv"],
            prep["wo_t"], prep["bo"])

    z_b = w_avg = None
    for single_buffer in (True, False):
        try:
            call = _build_mha_call(tgt_len, src_len, bsz, embed_dim, num_heads,
                                   block_b, query.dtype, single_buffer)
            z_b, w_avg = call(*args)
            break
        except Exception:
            if not single_buffer:
                raise
            # pl.Buffered(1) not accepted by this JAX build -> default buffering.

    z = jnp.swapaxes(z_b, 0, 1)                   # (tgt, bsz, E)
    return z, w_avg


# ----------------------------------------------------------------------------
# Pure-JAX reference (mirrors the PyTorch code path) for a sanity check.
# ----------------------------------------------------------------------------
def reference_forward(params, query, key, value, num_heads):
    tgt_len, bsz, embed_dim = query.shape
    src_len = key.shape[0]
    head_dim = embed_dim // num_heads
    scaling = float(head_dim) ** (-0.5)

    q = query @ params["wq"].T + params["bq"]
    k = key @ params["wk"].T + params["bk"]
    v = value @ params["wv"].T + params["bv"]
    q = q * scaling

    q = q.reshape(tgt_len, bsz * num_heads, head_dim).transpose(1, 0, 2)
    k = k.reshape(src_len, bsz * num_heads, head_dim).transpose(1, 0, 2)
    v = v.reshape(src_len, bsz * num_heads, head_dim).transpose(1, 0, 2)

    s = jnp.einsum("bqd,bkd->bqk", q, k)
    p = jax.nn.softmax(s, axis=-1)
    o = jnp.einsum("bqk,bkd->bqd", p, v)
    o = o.transpose(1, 0, 2).reshape(tgt_len, bsz, embed_dim)
    z = o @ params["wo"].T + params["bo"]
    w = p.reshape(bsz, num_heads, tgt_len, src_len).sum(axis=1) / num_heads
    return z, w


# ----------------------------------------------------------------------------
# Main
# ----------------------------------------------------------------------------
if __name__ == "__main__":
    embed_dim = 32
    num_heads = 4
    tgt_len = 8
    src_len = 8
    bsz = 2

    root = jax.random.PRNGKey(0)
    keys = jax.random.split(root, 11)
    wscale = 1.0 / float(embed_dim) ** 0.5

    params = {
        "wq": jax.random.normal(keys[0], (embed_dim, embed_dim), jnp.float32) * wscale,
        "bq": jax.random.normal(keys[1], (embed_dim,), jnp.float32) * 0.1,
        "wk": jax.random.normal(keys[2], (embed_dim, embed_dim), jnp.float32) * wscale,
        "bk": jax.random.normal(keys[3], (embed_dim,), jnp.float32) * 0.1,
        "wv": jax.random.normal(keys[4], (embed_dim, embed_dim), jnp.float32) * wscale,
        "bv": jax.random.normal(keys[5], (embed_dim,), jnp.float32) * 0.1,
        "wo": jax.random.normal(keys[6], (embed_dim, embed_dim), jnp.float32) * wscale,
        "bo": jax.random.normal(keys[7], (embed_dim,), jnp.float32) * 0.1,
    }

    query = jax.random.normal(keys[8], (tgt_len, bsz, embed_dim), jnp.float32)
    key = jax.random.normal(keys[9], (src_len, bsz, embed_dim), jnp.float32)
    value = jax.random.normal(keys[10], (src_len, bsz, embed_dim), jnp.float32)

    prep = prepare_params(params, num_heads)            # one-time param prep

    z, w_avg = mha_forward(prep, query, key, value)
    z = jax.block_until_ready(z)
    w_avg = jax.block_until_ready(w_avg)

    z_ref, w_ref = reference_forward(params, query, key, value, num_heads)
    assert z.shape == (tgt_len, bsz, embed_dim)
    assert w_avg.shape == (bsz, tgt_len, src_len)

    # Softmax normalization in the kernel is exact: every averaged-attention
    # row sums to 1 up to f32 rounding.
    assert jnp.allclose(jnp.sum(w_avg, axis=-1), 1.0, atol=1e-5)

    # Residual tolerance covers matmul-precision differences between the
    # in-kernel MXU dots and the XLA reference's default-precision einsums
    # (not the kernel softmax, which is exact — see row-sum check above).
    assert jnp.allclose(z, z_ref, atol=5e-3, rtol=5e-3)
    assert jnp.allclose(w_avg, w_ref, atol=2e-3, rtol=2e-3)

    print("KERNEL_OK")
</pallas_src>

<mosaic_0001>
module attributes {stable_mosaic.version = 11 : i64} {
  func.func @_mha_fused_kernel(%arg0: i32, %arg1: memref<1x8x32xf32, #tpu.memory_space<vmem>>, %arg2: memref<1x8x32xf32, #tpu.memory_space<vmem>>, %arg3: memref<1x8x32xf32, #tpu.memory_space<vmem>>, %arg4: memref<32x32xf32, #tpu.memory_space<vmem>>, %arg5: memref<32x32xf32, #tpu.memory_space<vmem>>, %arg6: memref<32x32xf32, #tpu.memory_space<vmem>>, %arg7: memref<1x32xf32, #tpu.memory_space<vmem>>, %arg8: memref<1x32xf32, #tpu.memory_space<vmem>>, %arg9: memref<1x32xf32, #tpu.memory_space<vmem>>, %arg10: memref<32x32xf32, #tpu.memory_space<vmem>>, %arg11: memref<1x32xf32, #tpu.memory_space<vmem>>, %arg12: memref<1x8x32xf32, #tpu.memory_space<vmem>>, %arg13: memref<1x8x8xf32, #tpu.memory_space<vmem>>, %arg14: memref<1x8x32xf32, #tpu.memory_space<vmem>>) attributes {dimension_semantics = [#tpu.dimension_semantics<parallel>], iteration_bounds = array<i64: 2>, scalar_prefetch = 0 : i64, scratch_operands = 1 : i64, tpu.core_type = #tpu.core_type<tc>, window_params = [{transform_indices = @transform_0, window_bounds = array<i64: 1, 8, 32>}, {transform_indices = @transform_1, window_bounds = array<i64: 1, 8, 32>}, {transform_indices = @transform_2, window_bounds = array<i64: 1, 8, 32>}, {pipeline_mode = #tpu.pipeline_mode<synchronous>, transform_indices = @transform_3, window_bounds = array<i64: 32, 32>}, {pipeline_mode = #tpu.pipeline_mode<synchronous>, transform_indices = @transform_4, window_bounds = array<i64: 32, 32>}, {pipeline_mode = #tpu.pipeline_mode<synchronous>, transform_indices = @transform_5, window_bounds = array<i64: 32, 32>}, {pipeline_mode = #tpu.pipeline_mode<synchronous>, transform_indices = @transform_6, window_bounds = array<i64: 1, 32>}, {pipeline_mode = #tpu.pipeline_mode<synchronous>, transform_indices = @transform_7, window_bounds = array<i64: 1, 32>}, {pipeline_mode = #tpu.pipeline_mode<synchronous>, transform_indices = @transform_8, window_bounds = array<i64: 1, 32>}, {pipeline_mode = #tpu.pipeline_mode<synchronous>, transform_indices = @transform_9, window_bounds = array<i64: 32, 32>}, {pipeline_mode = #tpu.pipeline_mode<synchronous>, transform_indices = @transform_10, window_bounds = array<i64: 1, 32>}, {transform_indices = @transform_11, window_bounds = array<i64: 1, 8, 32>}, {transform_indices = @transform_12, window_bounds = array<i64: 1, 8, 8>}]} {
    %c0 = arith.constant 0 : index
    %c0_0 = arith.constant 0 : index
    %c0_1 = arith.constant 0 : index
    %0 = vector.load %arg1[%c0, %c0_0, %c0_1] : memref<1x8x32xf32, #tpu.memory_space<vmem>>, vector<1x8x32xf32>
    %1 = vector.shape_cast %0 : vector<1x8x32xf32> to vector<8x32xf32>
    %c0_2 = arith.constant 0 : index
    %c0_3 = arith.constant 0 : index
    %c0_4 = arith.constant 0 : index
    %2 = vector.load %arg2[%c0_2, %c0_3, %c0_4] : memref<1x8x32xf32, #tpu.memory_space<vmem>>, vector<1x8x32xf32>
    %3 = vector.shape_cast %2 : vector<1x8x32xf32> to vector<8x32xf32>
    %c0_5 = arith.constant 0 : index
    %c0_6 = arith.constant 0 : index
    %c0_7 = arith.constant 0 : index
    %4 = vector.load %arg3[%c0_5, %c0_6, %c0_7] : memref<1x8x32xf32, #tpu.memory_space<vmem>>, vector<1x8x32xf32>
    %5 = vector.shape_cast %4 : vector<1x8x32xf32> to vector<8x32xf32>
    %c0_8 = arith.constant 0 : index
    %c0_9 = arith.constant 0 : index
    %6 = vector.load %arg4[%c0_8, %c0_9] : memref<32x32xf32, #tpu.memory_space<vmem>>, vector<32x32xf32>
    %cst = arith.constant dense<0.000000e+00> : vector<8x32xf32>
    %7 = tpu.matmul %1, %6, %cst {dimension_numbers = #tpu.dot_dimension_numbers<[1], [0], [0], [1], [0, 0, 1, 1], [], []>} : vector<8x32xf32>, vector<32x32xf32>, vector<8x32xf32> -> vector<8x32xf32>
    %c0_10 = arith.constant 0 : index
    %c0_11 = arith.constant 0 : index
    %8 = vector.load %arg7[%c0_10, %c0_11] : memref<1x32xf32, #tpu.memory_space<vmem>>, vector<1x32xf32>
    %9 = vector.broadcast %8 : vector<1x32xf32> to vector<8x32xf32>
    %10 = arith.addf %7, %9 : vector<8x32xf32>
    %c0_12 = arith.constant 0 : index
    %c0_13 = arith.constant 0 : index
    %11 = vector.load %arg5[%c0_12, %c0_13] : memref<32x32xf32, #tpu.memory_space<vmem>>, vector<32x32xf32>
    %cst_14 = arith.constant dense<0.000000e+00> : vector<8x32xf32>
    %12 = tpu.matmul %3, %11, %cst_14 {dimension_numbers = #tpu.dot_dimension_numbers<[1], [0], [0], [1], [0, 0, 1, 1], [], []>} : vector<8x32xf32>, vector<32x32xf32>, vector<8x32xf32> -> vector<8x32xf32>
    %c0_15 = arith.constant 0 : index
    %c0_16 = arith.constant 0 : index
    %13 = vector.load %arg8[%c0_15, %c0_16] : memref<1x32xf32, #tpu.memory_space<vmem>>, vector<1x32xf32>
    %14 = vector.broadcast %13 : vector<1x32xf32> to vector<8x32xf32>
    %15 = arith.addf %12, %14 : vector<8x32xf32>
    %c0_17 = arith.constant 0 : index
    %c0_18 = arith.constant 0 : index
    %16 = vector.load %arg6[%c0_17, %c0_18] : memref<32x32xf32, #tpu.memory_space<vmem>>, vector<32x32xf32>
    %cst_19 = arith.constant dense<0.000000e+00> : vector<8x32xf32>
    %17 = tpu.matmul %5, %16, %cst_19 {dimension_numbers = #tpu.dot_dimension_numbers<[1], [0], [0], [1], [0, 0, 1, 1], [], []>} : vector<8x32xf32>, vector<32x32xf32>, vector<8x32xf32> -> vector<8x32xf32>
    %c0_20 = arith.constant 0 : index
    %c0_21 = arith.constant 0 : index
    %18 = vector.load %arg9[%c0_20, %c0_21] : memref<1x32xf32, #tpu.memory_space<vmem>>, vector<1x32xf32>
    %19 = vector.broadcast %18 : vector<1x32xf32> to vector<8x32xf32>
    %20 = arith.addf %17, %19 : vector<8x32xf32>
    %21 = vector.shape_cast %10 : vector<8x32xf32> to vector<1x8x32xf32>
    %22 = vector.shape_cast %15 : vector<8x32xf32> to vector<1x8x32xf32>
    %23 = vector.shape_cast %20 : vector<8x32xf32> to vector<1x8x32xf32>
    %cst_22 = arith.constant 0.000000e+00 : f32
    %24 = vector.broadcast %cst_22 : f32 to vector<1x8x8xf32>
    %25 = vector.extract_strided_slice %21 {offsets = [0, 0, 0], sizes = [1, 8, 8], strides = [1, 1, 1]} : vector<1x8x32xf32> to vector<1x8x8xf32>
    %26 = vector.extract_strided_slice %22 {offsets = [0, 0, 0], sizes = [1, 8, 8], strides = [1, 1, 1]} : vector<1x8x32xf32> to vector<1x8x8xf32>
    %27 = vector.extract_strided_slice %23 {offsets = [0, 0, 0], sizes = [1, 8, 8], strides = [1, 1, 1]} : vector<1x8x32xf32> to vector<1x8x8xf32>
    "tpu.trace_start"() <{level = 10 : i32, message = "btd,bsd->bts"}> : () -> ()
    %cst_23 = arith.constant dense<0.000000e+00> : vector<1x8x8xf32>
    %28 = tpu.matmul %25, %26, %cst_23 {dimension_numbers = #tpu.dot_dimension_numbers<[2], [2], [1], [1], [0, 0, 0, 1, 1, 1], [0], [0]>} : vector<1x8x8xf32>, vector<1x8x8xf32>, vector<1x8x8xf32> -> vector<1x8x8xf32>
    "tpu.trace_stop"() : () -> ()
    %cst_24 = arith.constant dense<0xFF800000> : vector<1x8xf32>
    %29 = vector.multi_reduction <maximumf>, %28, %cst_24 [2] : vector<1x8x8xf32> to vector<1x8xf32>
    %30 = vector.shape_cast %29 : vector<1x8xf32> to vector<1x8x1xf32>
    %31 = vector.broadcast %30 : vector<1x8x1xf32> to vector<1x8x8xf32>
    %32 = arith.subf %28, %31 : vector<1x8x8xf32>
    %33 = math.exp %32 : vector<1x8x8xf32>
    %cst_25 = arith.constant dense<0.000000e+00> : vector<1x8xf32>
    %34 = vector.multi_reduction <add>, %33, %cst_25 [2] : vector<1x8x8xf32> to vector<1x8xf32>
    %35 = vector.shape_cast %34 : vector<1x8xf32> to vector<1x8x1xf32>
    %36 = vector.broadcast %35 : vector<1x8x1xf32> to vector<1x8x8xf32>
    %37 = arith.divf %33, %36 : vector<1x8x8xf32>
    %38 = arith.addf %24, %37 : vector<1x8x8xf32>
    "tpu.trace_start"() <{level = 10 : i32, message = "bts,bsd->btd"}> : () -> ()
    %cst_26 = arith.constant dense<0.000000e+00> : vector<1x8x8xf32>
    %39 = tpu.matmul %37, %27, %cst_26 {dimension_numbers = #tpu.dot_dimension_numbers<[2], [1], [1], [2], [0, 0, 0, 1, 1, 2], [0], [0]>} : vector<1x8x8xf32>, vector<1x8x8xf32>, vector<1x8x8xf32> -> vector<1x8x8xf32>
    "tpu.trace_stop"() : () -> ()
    %c0_27 = arith.constant 0 : index
    %c0_28 = arith.constant 0 : index
    %c0_29 = arith.constant 0 : index
    %40 = vector.load %arg14[%c0_27, %c0_28, %c0_29] : memref<1x8x32xf32, #tpu.memory_space<vmem>>, vector<1x8x8xf32>
    tpu.vector_store %arg14[%c0_27, %c0_28, %c0_29], %39 {strides = array<i32>} : memref<1x8x32xf32, #tpu.memory_space<vmem>>, vector<1x8x8xf32>,
    %41 = vector.extract_strided_slice %21 {offsets = [0, 0, 8], sizes = [1, 8, 8], strides = [1, 1, 1]} : vector<1x8x32xf32> to vector<1x8x8xf32>
    %42 = vector.extract_strided_slice %22 {offsets = [0, 0, 8], sizes = [1, 8, 8], strides = [1, 1, 1]} : vector<1x8x32xf32> to vector<1x8x8xf32>
    %43 = vector.extract_strided_slice %23 {offsets = [0, 0, 8], sizes = [1, 8, 8], strides = [1, 1, 1]} : vector<1x8x32xf32> to vector<1x8x8xf32>
    "tpu.trace_start"() <{level = 10 : i32, message = "btd,bsd->bts"}> : () -> ()
    %cst_30 = arith.constant dense<0.000000e+00> : vector<1x8x8xf32>
    %44 = tpu.matmul %41, %42, %cst_30 {dimension_numbers = #tpu.dot_dimension_numbers<[2], [2], [1], [1], [0, 0, 0, 1, 1, 1], [0], [0]>} : vector<1x8x8xf32>, vector<1x8x8xf32>, vector<1x8x8xf32> -> vector<1x8x8xf32>
    "tpu.trace_stop"() : () -> ()
    %cst_31 = arith.constant dense<0xFF800000> : vector<1x8xf32>
    %45 = vector.multi_reduction <maximumf>, %44, %cst_31 [2] : vector<1x8x8xf32> to vector<1x8xf32>
    %46 = vector.shape_cast %45 : vector<1x8xf32> to vector<1x8x1xf32>
    %47 = vector.broadcast %46 : vector<1x8x1xf32> to vector<1x8x8xf32>
    %48 = arith.subf %44, %47 : vector<1x8x8xf32>
    %49 = math.exp %48 : vector<1x8x8xf32>
    %cst_32 = arith.constant dense<0.000000e+00> : vector<1x8xf32>
    %50 = vector.multi_reduction <add>, %49, %cst_32 [2] : vector<1x8x8xf32> to vector<1x8xf32>
    %51 = vector.shape_cast %50 : vector<1x8xf32> to vector<1x8x1xf32>
    %52 = vector.broadcast %51 : vector<1x8x1xf32> to vector<1x8x8xf32>
    %53 = arith.divf %49, %52 : vector<1x8x8xf32>
    %54 = arith.addf %38, %53 : vector<1x8x8xf32>
    "tpu.trace_start"() <{level = 10 : i32, message = "bts,bsd->btd"}> : () -> ()
    %cst_33 = arith.constant dense<0.000000e+00> : vector<1x8x8xf32>
    %55 = tpu.matmul %53, %43, %cst_33 {dimension_numbers = #tpu.dot_dimension_numbers<[2], [1], [1], [2], [0, 0, 0, 1, 1, 2], [0], [0]>} : vector<1x8x8xf32>, vector<1x8x8xf32>, vector<1x8x8xf32> -> vector<1x8x8xf32>
    "tpu.trace_stop"() : () -> ()
    %c0_34 = arith.constant 0 : index
    %c0_35 = arith.constant 0 : index
    %c8 = arith.constant 8 : index
    %56 = vector.load %arg14[%c0_34, %c0_35, %c8] : memref<1x8x32xf32, #tpu.memory_space<vmem>>, vector<1x8x8xf32>
    tpu.vector_store %arg14[%c0_34, %c0_35, %c8], %55 {strides = array<i32>} : memref<1x8x32xf32, #tpu.memory_space<vmem>>, vector<1x8x8xf32>,
    %57 = vector.extract_strided_slice %21 {offsets = [0, 0, 16], sizes = [1, 8, 8], strides = [1, 1, 1]} : vector<1x8x32xf32> to vector<1x8x8xf32>
    %58 = vector.extract_strided_slice %22 {offsets = [0, 0, 16], sizes = [1, 8, 8], strides = [1, 1, 1]} : vector<1x8x32xf32> to vector<1x8x8xf32>
    %59 = vector.extract_strided_slice %23 {offsets = [0, 0, 16], sizes = [1, 8, 8], strides = [1, 1, 1]} : vector<1x8x32xf32> to vector<1x8x8xf32>
    "tpu.trace_start"() <{level = 10 : i32, message = "btd,bsd->bts"}> : () -> ()
    %cst_36 = arith.constant dense<0.000000e+00> : vector<1x8x8xf32>
    %60 = tpu.matmul %57, %58, %cst_36 {dimension_numbers = #tpu.dot_dimension_numbers<[2], [2], [1], [1], [0, 0, 0, 1, 1, 1], [0], [0]>} : vector<1x8x8xf32>, vector<1x8x8xf32>, vector<1x8x8xf32> -> vector<1x8x8xf32>
    "tpu.trace_stop"() : () -> ()
    %cst_37 = arith.constant dense<0xFF800000> : vector<1x8xf32>
    %61 = vector.multi_reduction <maximumf>, %60, %cst_37 [2] : vector<1x8x8xf32> to vector<1x8xf32>
    %62 = vector.shape_cast %61 : vector<1x8xf32> to vector<1x8x1xf32>
    %63 = vector.broadcast %62 : vector<1x8x1xf32> to vector<1x8x8xf32>
    %64 = arith.subf %60, %63 : vector<1x8x8xf32>
    %65 = math.exp %64 : vector<1x8x8xf32>
    %cst_38 = arith.constant dense<0.000000e+00> : vector<1x8xf32>
    %66 = vector.multi_reduction <add>, %65, %cst_38 [2] : vector<1x8x8xf32> to vector<1x8xf32>
    %67 = vector.shape_cast %66 : vector<1x8xf32> to vector<1x8x1xf32>
    %68 = vector.broadcast %67 : vector<1x8x1xf32> to vector<1x8x8xf32>
    %69 = arith.divf %65, %68 : vector<1x8x8xf32>
    %70 = arith.addf %54, %69 : vector<1x8x8xf32>
    "tpu.trace_start"() <{level = 10 : i32, message = "bts,bsd->btd"}> : () -> ()
    %cst_39 = arith.constant dense<0.000000e+00> : vector<1x8x8xf32>
    %71 = tpu.matmul %69, %59, %cst_39 {dimension_numbers = #tpu.dot_dimension_numbers<[2], [1], [1], [2], [0, 0, 0, 1, 1, 2], [0], [0]>} : vector<1x8x8xf32>, vector<1x8x8xf32>, vector<1x8x8xf32> -> vector<1x8x8xf32>
    "tpu.trace_stop"() : () -> ()
    %c0_40 = arith.constant 0 : index
    %c0_41 = arith.constant 0 : index
    %c16 = arith.constant 16 : index
    %72 = vector.load %arg14[%c0_40, %c0_41, %c16] : memref<1x8x32xf32, #tpu.memory_space<vmem>>, vector<1x8x8xf32>
    tpu.vector_store %arg14[%c0_40, %c0_41, %c16], %71 {strides = array<i32>} : memref<1x8x32xf32, #tpu.memory_space<vmem>>, vector<1x8x8xf32>,
    %73 = vector.extract_strided_slice %21 {offsets = [0, 0, 24], sizes = [1, 8, 8], strides = [1, 1, 1]} : vector<1x8x32xf32> to vector<1x8x8xf32>
    %74 = vector.extract_strided_slice %22 {offsets = [0, 0, 24], sizes = [1, 8, 8], strides = [1, 1, 1]} : vector<1x8x32xf32> to vector<1x8x8xf32>
    %75 = vector.extract_strided_slice %23 {offsets = [0, 0, 24], sizes = [1, 8, 8], strides = [1, 1, 1]} : vector<1x8x32xf32> to vector<1x8x8xf32>
    "tpu.trace_start"() <{level = 10 : i32, message = "btd,bsd->bts"}> : () -> ()
    %cst_42 = arith.constant dense<0.000000e+00> : vector<1x8x8xf32>
    %76 = tpu.matmul %73, %74, %cst_42 {dimension_numbers = #tpu.dot_dimension_numbers<[2], [2], [1], [1], [0, 0, 0, 1, 1, 1], [0], [0]>} : vector<1x8x8xf32>, vector<1x8x8xf32>, vector<1x8x8xf32> -> vector<1x8x8xf32>
    "tpu.trace_stop"() : () -> ()
    %cst_43 = arith.constant dense<0xFF800000> : vector<1x8xf32>
    %77 = vector.multi_reduction <maximumf>, %76, %cst_43 [2] : vector<1x8x8xf32> to vector<1x8xf32>
    %78 = vector.shape_cast %77 : vector<1x8xf32> to vector<1x8x1xf32>
    %79 = vector.broadcast %78 : vector<1x8x1xf32> to vector<1x8x8xf32>
    %80 = arith.subf %76, %79 : vector<1x8x8xf32>
    %81 = math.exp %80 : vector<1x8x8xf32>
    %cst_44 = arith.constant dense<0.000000e+00> : vector<1x8xf32>
    %82 = vector.multi_reduction <add>, %81, %cst_44 [2] : vector<1x8x8xf32> to vector<1x8xf32>
    %83 = vector.shape_cast %82 : vector<1x8xf32> to vector<1x8x1xf32>
    %84 = vector.broadcast %83 : vector<1x8x1xf32> to vector<1x8x8xf32>
    %85 = arith.divf %81, %84 : vector<1x8x8xf32>
    %86 = arith.addf %70, %85 : vector<1x8x8xf32>
    "tpu.trace_start"() <{level = 10 : i32, message = "bts,bsd->btd"}> : () -> ()
    %cst_45 = arith.constant dense<0.000000e+00> : vector<1x8x8xf32>
    %87 = tpu.matmul %85, %75, %cst_45 {dimension_numbers = #tpu.dot_dimension_numbers<[2], [1], [1], [2], [0, 0, 0, 1, 1, 2], [0], [0]>} : vector<1x8x8xf32>, vector<1x8x8xf32>, vector<1x8x8xf32> -> vector<1x8x8xf32>
    "tpu.trace_stop"() : () -> ()
    %c0_46 = arith.constant 0 : index
    %c0_47 = arith.constant 0 : index
    %c24 = arith.constant 24 : index
    %88 = vector.load %arg14[%c0_46, %c0_47, %c24] : memref<1x8x32xf32, #tpu.memory_space<vmem>>, vector<1x8x8xf32>
    tpu.vector_store %arg14[%c0_46, %c0_47, %c24], %87 {strides = array<i32>} : memref<1x8x32xf32, #tpu.memory_space<vmem>>, vector<1x8x8xf32>,
    %c0_48 = arith.constant 0 : index
    %c0_49 = arith.constant 0 : index
    %c0_50 = arith.constant 0 : index
    %89 = vector.load %arg14[%c0_48, %c0_49, %c0_50] : memref<1x8x32xf32, #tpu.memory_space<vmem>>, vector<1x8x32xf32>
    %90 = vector.shape_cast %89 : vector<1x8x32xf32> to vector<8x32xf32>
    %c0_51 = arith.constant 0 : index
    %c0_52 = arith.constant 0 : index
    %91 = vector.load %arg10[%c0_51, %c0_52] : memref<32x32xf32, #tpu.memory_space<vmem>>, vector<32x32xf32>
    %cst_53 = arith.constant dense<0.000000e+00> : vector<8x32xf32>
    %92 = tpu.matmul %90, %91, %cst_53 {dimension_numbers = #tpu.dot_dimension_numbers<[1], [0], [0], [1], [0, 0, 1, 1], [], []>} : vector<8x32xf32>, vector<32x32xf32>, vector<8x32xf32> -> vector<8x32xf32>
    %c0_54 = arith.constant 0 : index
    %c0_55 = arith.constant 0 : index
    %93 = vector.load %arg11[%c0_54, %c0_55] : memref<1x32xf32, #tpu.memory_space<vmem>>, vector<1x32xf32>
    %94 = vector.broadcast %93 : vector<1x32xf32> to vector<8x32xf32>
    %95 = arith.addf %92, %94 : vector<8x32xf32>
    %96 = vector.shape_cast %95 : vector<8x32xf32> to vector<1x8x32xf32>
    %c0_56 = arith.constant 0 : index
    %c0_57 = arith.constant 0 : index
    %c0_58 = arith.constant 0 : index
    %97 = vector.load %arg12[%c0_56, %c0_57, %c0_58] : memref<1x8x32xf32, #tpu.memory_space<vmem>>, vector<1x8x32xf32>
    tpu.vector_store %arg12[%c0_56, %c0_57, %c0_58], %96 {strides = array<i32>} : memref<1x8x32xf32, #tpu.memory_space<vmem>>, vector<1x8x32xf32>,
    %cst_59 = arith.constant 2.500000e-01 : f32
    %98 = vector.broadcast %cst_59 : f32 to vector<1x8x8xf32>
    %99 = arith.mulf %86, %98 : vector<1x8x8xf32>
    %c0_60 = arith.constant 0 : index
    %c0_61 = arith.constant 0 : index
    %c0_62 = arith.constant 0 : index
    %100 = vector.load %arg13[%c0_60, %c0_61, %c0_62] : memref<1x8x8xf32, #tpu.memory_space<vmem>>, vector<1x8x8xf32>
    tpu.vector_store %arg13[%c0_60, %c0_61, %c0_62], %99 {strides = array<i32>} : memref<1x8x8xf32, #tpu.memory_space<vmem>>, vector<1x8x8xf32>,
    return
  }
  func.func @transform_0(%arg0: i32) -> (i32, i32, i32) {
    %c0_i32 = arith.constant 0 : i32
    %c0_i32_0 = arith.constant 0 : i32
    %c0_i32_1 = arith.constant 0 : i32
    return %arg0, %c0_i32, %c0_i32_0 : i32, i32, i32
  }
  func.func @transform_1(%arg0: i32) -> (i32, i32, i32) {
    %c0_i32 = arith.constant 0 : i32
    %c0_i32_0 = arith.constant 0 : i32
    %c0_i32_1 = arith.constant 0 : i32
    return %arg0, %c0_i32, %c0_i32_0 : i32, i32, i32
  }
  func.func @transform_2(%arg0: i32) -> (i32, i32, i32) {
    %c0_i32 = arith.constant 0 : i32
    %c0_i32_0 = arith.constant 0 : i32
    %c0_i32_1 = arith.constant 0 : i32
    return %arg0, %c0_i32, %c0_i32_0 : i32, i32, i32
  }
  func.func @transform_3(%arg0: i32) -> (i32, i32) {
    %c0_i32 = arith.constant 0 : i32
    %c0_i32_0 = arith.constant 0 : i32
    %c0_i32_1 = arith.constant 0 : i32
    return %c0_i32, %c0_i32_0 : i32, i32
  }
  func.func @transform_4(%arg0: i32) -> (i32, i32) {
    %c0_i32 = arith.constant 0 : i32
    %c0_i32_0 = arith.constant 0 : i32
    %c0_i32_1 = arith.constant 0 : i32
    return %c0_i32, %c0_i32_0 : i32, i32
  }
  func.func @transform_5(%arg0: i32) -> (i32, i32) {
    %c0_i32 = arith.constant 0 : i32
    %c0_i32_0 = arith.constant 0 : i32
    %c0_i32_1 = arith.constant 0 : i32
    return %c0_i32, %c0_i32_0 : i32, i32
  }
  func.func @transform_6(%arg0: i32) -> (i32, i32) {
    %c0_i32 = arith.constant 0 : i32
    %c0_i32_0 = arith.constant 0 : i32
    %c0_i32_1 = arith.constant 0 : i32
    return %c0_i32, %c0_i32_0 : i32, i32
  }
  func.func @transform_7(%arg0: i32) -> (i32, i32) {
    %c0_i32 = arith.constant 0 : i32
    %c0_i32_0 = arith.constant 0 : i32
    %c0_i32_1 = arith.constant 0 : i32
    return %c0_i32, %c0_i32_0 : i32, i32
  }
  func.func @transform_8(%arg0: i32) -> (i32, i32) {
    %c0_i32 = arith.constant 0 : i32
    %c0_i32_0 = arith.constant 0 : i32
    %c0_i32_1 = arith.constant 0 : i32
    return %c0_i32, %c0_i32_0 : i32, i32
  }
  func.func @transform_9(%arg0: i32) -> (i32, i32) {
    %c0_i32 = arith.constant 0 : i32
    %c0_i32_0 = arith.constant 0 : i32
    %c0_i32_1 = arith.constant 0 : i32
    return %c0_i32, %c0_i32_0 : i32, i32
  }
  func.func @transform_10(%arg0: i32) -> (i32, i32) {
    %c0_i32 = arith.constant 0 : i32
    %c0_i32_0 = arith.constant 0 : i32
    %c0_i32_1 = arith.constant 0 : i32
    return %c0_i32, %c0_i32_0 : i32, i32
  }
  func.func @transform_11(%arg0: i32) -> (i32, i32, i32) {
    %c0_i32 = arith.constant 0 : i32
    %c0_i32_0 = arith.constant 0 : i32
    %c0_i32_1 = arith.constant 0 : i32
    return %arg0, %c0_i32, %c0_i32_0 : i32, i32, i32
  }
  func.func @transform_12(%arg0: i32) -> (i32, i32, i32) {
    %c0_i32 = arith.constant 0 : i32
    %c0_i32_0 = arith.constant 0 : i32
    %c0_i32_1 = arith.constant 0 : i32
    return %arg0, %c0_i32, %c0_i32_0 : i32, i32, i32
  }
}

module attributes {stable_mosaic.version = 11 : i64} {
  func.func @_mha_fused_kernel(%arg0: i32, %arg1: memref<1x8x32xf32, #tpu.memory_space<vmem>>, %arg2: memref<1x8x32xf32, #tpu.memory_space<vmem>>, %arg3: memref<1x8x32xf32, #tpu.memory_space<vmem>>, %arg4: memref<32x32xf32, #tpu.memory_space<vmem>>, %arg5: memref<32x32xf32, #tpu.memory_space<vmem>>, %arg6: memref<32x32xf32, #tpu.memory_space<vmem>>, %arg7: memref<1x32xf32, #tpu.memory_space<vmem>>, %arg8: memref<1x32xf32, #tpu.memory_space<vmem>>, %arg9: memref<1x32xf32, #tpu.memory_space<vmem>>, %arg10: memref<32x32xf32, #tpu.memory_space<vmem>>, %arg11: memref<1x32xf32, #tpu.memory_space<vmem>>, %arg12: memref<1x8x32xf32, #tpu.memory_space<vmem>>, %arg13: memref<1x8x8xf32, #tpu.memory_space<vmem>>, %arg14: memref<1x8x32xf32, #tpu.memory_space<vmem>>) attributes {dimension_semantics = [#tpu.dimension_semantics<parallel>], iteration_bounds = array<i64: 2>, scalar_prefetch = 0 : i64, scratch_operands = 1 : i64, tpu.core_type = #tpu.core_type<tc>, window_params = [{transform_indices = @transform_0, window_bounds = array<i64: 1, 8, 32>}, {transform_indices = @transform_1, window_bounds = array<i64: 1, 8, 32>}, {transform_indices = @transform_2, window_bounds = array<i64: 1, 8, 32>}, {pipeline_mode = #tpu.pipeline_mode<synchronous>, transform_indices = @transform_3, window_bounds = array<i64: 32, 32>}, {pipeline_mode = #tpu.pipeline_mode<synchronous>, transform_indices = @transform_4, window_bounds = array<i64: 32, 32>}, {pipeline_mode = #tpu.pipeline_mode<synchronous>, transform_indices = @transform_5, window_bounds = array<i64: 32, 32>}, {pipeline_mode = #tpu.pipeline_mode<synchronous>, transform_indices = @transform_6, window_bounds = array<i64: 1, 32>}, {pipeline_mode = #tpu.pipeline_mode<synchronous>, transform_indices = @transform_7, window_bounds = array<i64: 1, 32>}, {pipeline_mode = #tpu.pipeline_mode<synchronous>, transform_indices = @transform_8, window_bounds = array<i64: 1, 32>}, {pipeline_mode = #tpu.pipeline_mode<synchronous>, transform_indices = @transform_9, window_bounds = array<i64: 32, 32>}, {pipeline_mode = #tpu.pipeline_mode<synchronous>, transform_indices = @transform_10, window_bounds = array<i64: 1, 32>}, {transform_indices = @transform_11, window_bounds = array<i64: 1, 8, 32>}, {transform_indices = @transform_12, window_bounds = array<i64: 1, 8, 8>}]} {
    %c0 = arith.constant 0 : index
    %c0_0 = arith.constant 0 : index
    %c0_1 = arith.constant 0 : index
    %0 = vector.load %arg1[%c0, %c0_0, %c0_1] : memref<1x8x32xf32, #tpu.memory_space<vmem>>, vector<1x8x32xf32>
    %1 = vector.shape_cast %0 : vector<1x8x32xf32> to vector<8x32xf32>
    %c0_2 = arith.constant 0 : index
    %c0_3 = arith.constant 0 : index
    %c0_4 = arith.constant 0 : index
    %2 = vector.load %arg2[%c0_2, %c0_3, %c0_4] : memref<1x8x32xf32, #tpu.memory_space<vmem>>, vector<1x8x32xf32>
    %3 = vector.shape_cast %2 : vector<1x8x32xf32> to vector<8x32xf32>
    %c0_5 = arith.constant 0 : index
    %c0_6 = arith.constant 0 : index
    %c0_7 = arith.constant 0 : index
    %4 = vector.load %arg3[%c0_5, %c0_6, %c0_7] : memref<1x8x32xf32, #tpu.memory_space<vmem>>, vector<1x8x32xf32>
    %5 = vector.shape_cast %4 : vector<1x8x32xf32> to vector<8x32xf32>
    %c0_8 = arith.constant 0 : index
    %c0_9 = arith.constant 0 : index
    %6 = vector.load %arg4[%c0_8, %c0_9] : memref<32x32xf32, #tpu.memory_space<vmem>>, vector<32x32xf32>
    %cst = arith.constant dense<0.000000e+00> : vector<8x32xf32>
    %7 = tpu.matmul %1, %6, %cst {dimension_numbers = #tpu.dot_dimension_numbers<[1], [0], [0], [1], [0, 0, 1, 1], [], []>} : vector<8x32xf32>, vector<32x32xf32>, vector<8x32xf32> -> vector<8x32xf32>
    %c0_10 = arith.constant 0 : index
    %c0_11 = arith.constant 0 : index
    %8 = vector.load %arg7[%c0_10, %c0_11] : memref<1x32xf32, #tpu.memory_space<vmem>>, vector<1x32xf32>
    %9 = vector.broadcast %8 : vector<1x32xf32> to vector<8x32xf32>
    %10 = arith.addf %7, %9 : vector<8x32xf32>
    %c0_12 = arith.constant 0 : index
    %c0_13 = arith.constant 0 : index
    %11 = vector.load %arg5[%c0_12, %c0_13] : memref<32x32xf32, #tpu.memory_space<vmem>>, vector<32x32xf32>
    %cst_14 = arith.constant dense<0.000000e+00> : vector<8x32xf32>
    %12 = tpu.matmul %3, %11, %cst_14 {dimension_numbers = #tpu.dot_dimension_numbers<[1], [0], [0], [1], [0, 0, 1, 1], [], []>} : vector<8x32xf32>, vector<32x32xf32>, vector<8x32xf32> -> vector<8x32xf32>
    %c0_15 = arith.constant 0 : index
    %c0_16 = arith.constant 0 : index
    %13 = vector.load %arg8[%c0_15, %c0_16] : memref<1x32xf32, #tpu.memory_space<vmem>>, vector<1x32xf32>
    %14 = vector.broadcast %13 : vector<1x32xf32> to vector<8x32xf32>
    %15 = arith.addf %12, %14 : vector<8x32xf32>
    %c0_17 = arith.constant 0 : index
    %c0_18 = arith.constant 0 : index
    %16 = vector.load %arg6[%c0_17, %c0_18] : memref<32x32xf32, #tpu.memory_space<vmem>>, vector<32x32xf32>
    %cst_19 = arith.constant dense<0.000000e+00> : vector<8x32xf32>
    %17 = tpu.matmul %5, %16, %cst_19 {dimension_numbers = #tpu.dot_dimension_numbers<[1], [0], [0], [1], [0, 0, 1, 1], [], []>} : vector<8x32xf32>, vector<32x32xf32>, vector<8x32xf32> -> vector<8x32xf32>
    %c0_20 = arith.constant 0 : index
    %c0_21 = arith.constant 0 : index
    %18 = vector.load %arg9[%c0_20, %c0_21] : memref<1x32xf32, #tpu.memory_space<vmem>>, vector<1x32xf32>
    %19 = vector.broadcast %18 : vector<1x32xf32> to vector<8x32xf32>
    %20 = arith.addf %17, %19 : vector<8x32xf32>
    %21 = vector.shape_cast %10 : vector<8x32xf32> to vector<1x8x32xf32>
    %22 = vector.shape_cast %15 : vector<8x32xf32> to vector<1x8x32xf32>
    %23 = vector.shape_cast %20 : vector<8x32xf32> to vector<1x8x32xf32>
    %cst_22 = arith.constant 0.000000e+00 : f32
    %24 = vector.broadcast %cst_22 : f32 to vector<1x8x8xf32>
    %25 = vector.extract_strided_slice %21 {offsets = [0, 0, 0], sizes = [1, 8, 8], strides = [1, 1, 1]} : vector<1x8x32xf32> to vector<1x8x8xf32>
    %26 = vector.extract_strided_slice %22 {offsets = [0, 0, 0], sizes = [1, 8, 8], strides = [1, 1, 1]} : vector<1x8x32xf32> to vector<1x8x8xf32>
    %27 = vector.extract_strided_slice %23 {offsets = [0, 0, 0], sizes = [1, 8, 8], strides = [1, 1, 1]} : vector<1x8x32xf32> to vector<1x8x8xf32>
    "tpu.trace_start"() <{level = 10 : i32, message = "btd,bsd->bts"}> : () -> ()
    %cst_23 = arith.constant dense<0.000000e+00> : vector<1x8x8xf32>
    %28 = tpu.matmul %25, %26, %cst_23 {dimension_numbers = #tpu.dot_dimension_numbers<[2], [2], [1], [1], [0, 0, 0, 1, 1, 1], [0], [0]>} : vector<1x8x8xf32>, vector<1x8x8xf32>, vector<1x8x8xf32> -> vector<1x8x8xf32>
    "tpu.trace_stop"() : () -> ()
    %cst_24 = arith.constant dense<0xFF800000> : vector<1x8xf32>
    %29 = vector.multi_reduction <maximumf>, %28, %cst_24 [2] : vector<1x8x8xf32> to vector<1x8xf32>
    %30 = vector.shape_cast %29 : vector<1x8xf32> to vector<1x8x1xf32>
    %31 = vector.broadcast %30 : vector<1x8x1xf32> to vector<1x8x8xf32>
    %32 = arith.subf %28, %31 : vector<1x8x8xf32>
    %33 = math.exp %32 : vector<1x8x8xf32>
    %cst_25 = arith.constant dense<0.000000e+00> : vector<1x8xf32>
    %34 = vector.multi_reduction <add>, %33, %cst_25 [2] : vector<1x8x8xf32> to vector<1x8xf32>
    %35 = vector.shape_cast %34 : vector<1x8xf32> to vector<1x8x1xf32>
    %36 = vector.broadcast %35 : vector<1x8x1xf32> to vector<1x8x8xf32>
    %37 = arith.divf %33, %36 : vector<1x8x8xf32>
    %38 = arith.addf %24, %37 : vector<1x8x8xf32>
    "tpu.trace_start"() <{level = 10 : i32, message = "bts,bsd->btd"}> : () -> ()
    %cst_26 = arith.constant dense<0.000000e+00> : vector<1x8x8xf32>
    %39 = tpu.matmul %37, %27, %cst_26 {dimension_numbers = #tpu.dot_dimension_numbers<[2], [1], [1], [2], [0, 0, 0, 1, 1, 2], [0], [0]>} : vector<1x8x8xf32>, vector<1x8x8xf32>, vector<1x8x8xf32> -> vector<1x8x8xf32>
    "tpu.trace_stop"() : () -> ()
    %c0_27 = arith.constant 0 : index
    %c0_28 = arith.constant 0 : index
    %c0_29 = arith.constant 0 : index
    %40 = vector.load %arg14[%c0_27, %c0_28, %c0_29] : memref<1x8x32xf32, #tpu.memory_space<vmem>>, vector<1x8x8xf32>
    tpu.vector_store %arg14[%c0_27, %c0_28, %c0_29], %39 {strides = array<i32>} : memref<1x8x32xf32, #tpu.memory_space<vmem>>, vector<1x8x8xf32>,
    %41 = vector.extract_strided_slice %21 {offsets = [0, 0, 8], sizes = [1, 8, 8], strides = [1, 1, 1]} : vector<1x8x32xf32> to vector<1x8x8xf32>
    %42 = vector.extract_strided_slice %22 {offsets = [0, 0, 8], sizes = [1, 8, 8], strides = [1, 1, 1]} : vector<1x8x32xf32> to vector<1x8x8xf32>
    %43 = vector.extract_strided_slice %23 {offsets = [0, 0, 8], sizes = [1, 8, 8], strides = [1, 1, 1]} : vector<1x8x32xf32> to vector<1x8x8xf32>
    "tpu.trace_start"() <{level = 10 : i32, message = "btd,bsd->bts"}> : () -> ()
    %cst_30 = arith.constant dense<0.000000e+00> : vector<1x8x8xf32>
    %44 = tpu.matmul %41, %42, %cst_30 {dimension_numbers = #tpu.dot_dimension_numbers<[2], [2], [1], [1], [0, 0, 0, 1, 1, 1], [0], [0]>} : vector<1x8x8xf32>, vector<1x8x8xf32>, vector<1x8x8xf32> -> vector<1x8x8xf32>
    "tpu.trace_stop"() : () -> ()
    %cst_31 = arith.constant dense<0xFF800000> : vector<1x8xf32>
    %45 = vector.multi_reduction <maximumf>, %44, %cst_31 [2] : vector<1x8x8xf32> to vector<1x8xf32>
    %46 = vector.shape_cast %45 : vector<1x8xf32> to vector<1x8x1xf32>
    %47 = vector.broadcast %46 : vector<1x8x1xf32> to vector<1x8x8xf32>
    %48 = arith.subf %44, %47 : vector<1x8x8xf32>
    %49 = math.exp %48 : vector<1x8x8xf32>
    %cst_32 = arith.constant dense<0.000000e+00> : vector<1x8xf32>
    %50 = vector.multi_reduction <add>, %49, %cst_32 [2] : vector<1x8x8xf32> to vector<1x8xf32>
    %51 = vector.shape_cast %50 : vector<1x8xf32> to vector<1x8x1xf32>
    %52 = vector.broadcast %51 : vector<1x8x1xf32> to vector<1x8x8xf32>
    %53 = arith.divf %49, %52 : vector<1x8x8xf32>
    %54 = arith.addf %38, %53 : vector<1x8x8xf32>
    "tpu.trace_start"() <{level = 10 : i32, message = "bts,bsd->btd"}> : () -> ()
    %cst_33 = arith.constant dense<0.000000e+00> : vector<1x8x8xf32>
    %55 = tpu.matmul %53, %43, %cst_33 {dimension_numbers = #tpu.dot_dimension_numbers<[2], [1], [1], [2], [0, 0, 0, 1, 1, 2], [0], [0]>} : vector<1x8x8xf32>, vector<1x8x8xf32>, vector<1x8x8xf32> -> vector<1x8x8xf32>
    "tpu.trace_stop"() : () -> ()
    %c0_34 = arith.constant 0 : index
    %c0_35 = arith.constant 0 : index
    %c8 = arith.constant 8 : index
    %56 = vector.load %arg14[%c0_34, %c0_35, %c8] : memref<1x8x32xf32, #tpu.memory_space<vmem>>, vector<1x8x8xf32>
    tpu.vector_store %arg14[%c0_34, %c0_35, %c8], %55 {strides = array<i32>} : memref<1x8x32xf32, #tpu.memory_space<vmem>>, vector<1x8x8xf32>,
    %57 = vector.extract_strided_slice %21 {offsets = [0, 0, 16], sizes = [1, 8, 8], strides = [1, 1, 1]} : vector<1x8x32xf32> to vector<1x8x8xf32>
    %58 = vector.extract_strided_slice %22 {offsets = [0, 0, 16], sizes = [1, 8, 8], strides = [1, 1, 1]} : vector<1x8x32xf32> to vector<1x8x8xf32>
    %59 = vector.extract_strided_slice %23 {offsets = [0, 0, 16], sizes = [1, 8, 8], strides = [1, 1, 1]} : vector<1x8x32xf32> to vector<1x8x8xf32>
    "tpu.trace_start"() <{level = 10 : i32, message = "btd,bsd->bts"}> : () -> ()
    %cst_36 = arith.constant dense<0.000000e+00> : vector<1x8x8xf32>
    %60 = tpu.matmul %57, %58, %cst_36 {dimension_numbers = #tpu.dot_dimension_numbers<[2], [2], [1], [1], [0, 0, 0, 1, 1, 1], [0], [0]>} : vector<1x8x8xf32>, vector<1x8x8xf32>, vector<1x8x8xf32> -> vector<1x8x8xf32>
    "tpu.trace_stop"() : () -> ()
    %cst_37 = arith.constant dense<0xFF800000> : vector<1x8xf32>
    %61 = vector.multi_reduction <maximumf>, %60, %cst_37 [2] : vector<1x8x8xf32> to vector<1x8xf32>
    %62 = vector.shape_cast %61 : vector<1x8xf32> to vector<1x8x1xf32>
    %63 = vector.broadcast %62 : vector<1x8x1xf32> to vector<1x8x8xf32>
    %64 = arith.subf %60, %63 : vector<1x8x8xf32>
    %65 = math.exp %64 : vector<1x8x8xf32>
    %cst_38 = arith.constant dense<0.000000e+00> : vector<1x8xf32>
    %66 = vector.multi_reduction <add>, %65, %cst_38 [2] : vector<1x8x8xf32> to vector<1x8xf32>
    %67 = vector.shape_cast %66 : vector<1x8xf32> to vector<1x8x1xf32>
    %68 = vector.broadcast %67 : vector<1x8x1xf32> to vector<1x8x8xf32>
    %69 = arith.divf %65, %68 : vector<1x8x8xf32>
    %70 = arith.addf %54, %69 : vector<1x8x8xf32>
    "tpu.trace_start"() <{level = 10 : i32, message = "bts,bsd->btd"}> : () -> ()
    %cst_39 = arith.constant dense<0.000000e+00> : vector<1x8x8xf32>
    %71 = tpu.matmul %69, %59, %cst_39 {dimension_numbers = #tpu.dot_dimension_numbers<[2], [1], [1], [2], [0, 0, 0, 1, 1, 2], [0], [0]>} : vector<1x8x8xf32>, vector<1x8x8xf32>, vector<1x8x8xf32> -> vector<1x8x8xf32>
    "tpu.trace_stop"() : () -> ()
    %c0_40 = arith.constant 0 : index
    %c0_41 = arith.constant 0 : index
    %c16 = arith.constant 16 : index
    %72 = vector.load %arg14[%c0_40, %c0_41, %c16] : memref<1x8x32xf32, #tpu.memory_space<vmem>>, vector<1x8x8xf32>
    tpu.vector_store %arg14[%c0_40, %c0_41, %c16], %71 {strides = array<i32>} : memref<1x8x32xf32, #tpu.memory_space<vmem>>, vector<1x8x8xf32>,
    %73 = vector.extract_strided_slice %21 {offsets = [0, 0, 24], sizes = [1, 8, 8], strides = [1, 1, 1]} : vector<1x8x32xf32> to vector<1x8x8xf32>
    %74 = vector.extract_strided_slice %22 {offsets = [0, 0, 24], sizes = [1, 8, 8], strides = [1, 1, 1]} : vector<1x8x32xf32> to vector<1x8x8xf32>
    %75 = vector.extract_strided_slice %23 {offsets = [0, 0, 24], sizes = [1, 8, 8], strides = [1, 1, 1]} : vector<1x8x32xf32> to vector<1x8x8xf32>
    "tpu.trace_start"() <{level = 10 : i32, message = "btd,bsd->bts"}> : () -> ()
    %cst_42 = arith.constant dense<0.000000e+00> : vector<1x8x8xf32>
    %76 = tpu.matmul %73, %74, %cst_42 {dimension_numbers = #tpu.dot_dimension_numbers<[2], [2], [1], [1], [0, 0, 0, 1, 1, 1], [0], [0]>} : vector<1x8x8xf32>, vector<1x8x8xf32>, vector<1x8x8xf32> -> vector<1x8x8xf32>
    "tpu.trace_stop"() : () -> ()
    %cst_43 = arith.constant dense<0xFF800000> : vector<1x8xf32>
    %77 = vector.multi_reduction <maximumf>, %76, %cst_43 [2] : vector<1x8x8xf32> to vector<1x8xf32>
    %78 = vector.shape_cast %77 : vector<1x8xf32> to vector<1x8x1xf32>
    %79 = vector.broadcast %78 : vector<1x8x1xf32> to vector<1x8x8xf32>
    %80 = arith.subf %76, %79 : vector<1x8x8xf32>
    %81 = math.exp %80 : vector<1x8x8xf32>
    %cst_44 = arith.constant dense<0.000000e+00> : vector<1x8xf32>
    %82 = vector.multi_reduction <add>, %81, %cst_44 [2] : vector<1x8x8xf32> to vector<1x8xf32>
    %83 = vector.shape_cast %82 : vector<1x8xf32> to vector<1x8x1xf32>
    %84 = vector.broadcast %83 : vector<1x8x1xf32> to vector<1x8x8xf32>
    %85 = arith.divf %81, %84 : vector<1x8x8xf32>
    %86 = arith.addf %70, %85 : vector<1x8x8xf32>
    "tpu.trace_start"() <{level = 10 : i32, message = "bts,bsd->btd"}> : () -> ()
    %cst_45 = arith.constant dense<0.000000e+00> : vector<1x8x8xf32>
    %87 = tpu.matmul %85, %75, %cst_45 {dimension_numbers = #tpu.dot_dimension_numbers<[2], [1], [1], [2], [0, 0, 0, 1, 1, 2], [0], [0]>} : vector<1x8x8xf32>, vector<1x8x8xf32>, vector<1x8x8xf32> -> vector<1x8x8xf32>
    "tpu.trace_stop"() : () -> ()
    %c0_46 = arith.constant 0 : index
    %c0_47 = arith.constant 0 : index
    %c24 = arith.constant 24 : index
    %88 = vector.load %arg14[%c0_46, %c0_47, %c24] : memref<1x8x32xf32, #tpu.memory_space<vmem>>, vector<1x8x8xf32>
    tpu.vector_store %arg14[%c0_46, %c0_47, %c24], %87 {strides = array<i32>} : memref<1x8x32xf32, #tpu.memory_space<vmem>>, vector<1x8x8xf32>,
    %c0_48 = arith.constant 0 : index
    %c0_49 = arith.constant 0 : index
    %c0_50 = arith.constant 0 : index
    %89 = vector.load %arg14[%c0_48, %c0_49, %c0_50] : memref<1x8x32xf32, #tpu.memory_space<vmem>>, vector<1x8x32xf32>
    %90 = vector.shape_cast %89 : vector<1x8x32xf32> to vector<8x32xf32>
    %c0_51 = arith.constant 0 : index
    %c0_52 = arith.constant 0 : index
    %91 = vector.load %arg10[%c0_51, %c0_52] : memref<32x32xf32, #tpu.memory_space<vmem>>, vector<32x32xf32>
    %cst_53 = arith.constant dense<0.000000e+00> : vector<8x32xf32>
    %92 = tpu.matmul %90, %91, %cst_53 {dimension_numbers = #tpu.dot_dimension_numbers<[1], [0], [0], [1], [0, 0, 1, 1], [], []>} : vector<8x32xf32>, vector<32x32xf32>, vector<8x32xf32> -> vector<8x32xf32>
    %c0_54 = arith.constant 0 : index
    %c0_55 = arith.constant 0 : index
    %93 = vector.load %arg11[%c0_54, %c0_55] : memref<1x32xf32, #tpu.memory_space<vmem>>, vector<1x32xf32>
    %94 = vector.broadcast %93 : vector<1x32xf32> to vector<8x32xf32>
    %95 = arith.addf %92, %94 : vector<8x32xf32>
    %96 = vector.shape_cast %95 : vector<8x32xf32> to vector<1x8x32xf32>
    %c0_56 = arith.constant 0 : index
    %c0_57 = arith.constant 0 : index
    %c0_58 = arith.constant 0 : index
    %97 = vector.load %arg12[%c0_56, %c0_57, %c0_58] : memref<1x8x32xf32, #tpu.memory_space<vmem>>, vector<1x8x32xf32>
    tpu.vector_store %arg12[%c0_56, %c0_57, %c0_58], %96 {strides = array<i32>} : memref<1x8x32xf32, #tpu.memory_space<vmem>>, vector<1x8x32xf32>,
    %cst_59 = arith.constant 2.500000e-01 : f32
    %98 = vector.broadcast %cst_59 : f32 to vector<1x8x8xf32>
    %99 = arith.mulf %86, %98 : vector<1x8x8xf32>
    %c0_60 = arith.constant 0 : index
    %c0_61 = arith.constant 0 : index
    %c0_62 = arith.constant 0 : index
    %100 = vector.load %arg13[%c0_60, %c0_61, %c0_62] : memref<1x8x8xf32, #tpu.memory_space<vmem>>, vector<1x8x8xf32>
    tpu.vector_store %arg13[%c0_60, %c0_61, %c0_62], %99 {strides = array<i32>} : memref<1x8x8xf32, #tpu.memory_space<vmem>>, vector<1x8x8xf32>,
    return
  }
  func.func @transform_0(%arg0: i32) -> (i32, i32, i32) {
    %c0_i32 = arith.constant 0 : i32
    %c0_i32_0 = arith.constant 0 : i32
    %c0_i32_1 = arith.constant 0 : i32
    return %arg0, %c0_i32, %c0_i32_0 : i32, i32, i32
  }
  func.func @transform_1(%arg0: i32) -> (i32, i32, i32) {
    %c0_i32 = arith.constant 0 : i32
    %c0_i32_0 = arith.constant 0 : i32
    %c0_i32_1 = arith.constant 0 : i32
    return %arg0, %c0_i32, %c0_i32_0 : i32, i32, i32
  }
  func.func @transform_2(%arg0: i32) -> (i32, i32, i32) {
    %c0_i32 = arith.constant 0 : i32
    %c0_i32_0 = arith.constant 0 : i32
    %c0_i32_1 = arith.constant 0 : i32
    return %arg0, %c0_i32, %c0_i32_0 : i32, i32, i32
  }
  func.func @transform_3(%arg0: i32) -> (i32, i32) {
    %c0_i32 = arith.constant 0 : i32
    %c0_i32_0 = arith.constant 0 : i32
    %c0_i32_1 = arith.constant 0 : i32
    return %c0_i32, %c0_i32_0 : i32, i32
  }
  func.func @transform_4(%arg0: i32) -> (i32, i32) {
    %c0_i32 = arith.constant 0 : i32
    %c0_i32_0 = arith.constant 0 : i32
    %c0_i32_1 = arith.constant 0 : i32
    return %c0_i32, %c0_i32_0 : i32, i32
  }
  func.func @transform_5(%arg0: i32) -> (i32, i32) {
    %c0_i32 = arith.constant 0 : i32
    %c0_i32_0 = arith.constant 0 : i32
    %c0_i32_1 = arith.constant 0 : i32
    return %c0_i32, %c0_i32_0 : i32, i32
  }
  func.func @transform_6(%arg0: i32) -> (i32, i32) {
    %c0_i32 = arith.constant 0 : i32
    %c0_i32_0 = arith.constant 0 : i32
    %c0_i32_1 = arith.constant 0 : i32
    return %c0_i32, %c0_i32_0 : i32, i32
  }
  func.func @transform_7(%arg0: i32) -> (i32, i32) {
    %c0_i32 = arith.constant 0 : i32
    %c0_i32_0 = arith.constant 0 : i32
    %c0_i32_1 = arith.constant 0 : i32
    return %c0_i32, %c0_i32_0 : i32, i32
  }
  func.func @transform_8(%arg0: i32) -> (i32, i32) {
    %c0_i32 = arith.constant 0 : i32
    %c0_i32_0 = arith.constant 0 : i32
    %c0_i32_1 = arith.constant 0 : i32
    return %c0_i32, %c0_i32_0 : i32, i32
  }
  func.func @transform_9(%arg0: i32) -> (i32, i32) {
    %c0_i32 = arith.constant 0 : i32
    %c0_i32_0 = arith.constant 0 : i32
    %c0_i32_1 = arith.constant 0 : i32
    return %c0_i32, %c0_i32_0 : i32, i32
  }
  func.func @transform_10(%arg0: i32) -> (i32, i32) {
    %c0_i32 = arith.constant 0 : i32
    %c0_i32_0 = arith.constant 0 : i32
    %c0_i32_1 = arith.constant 0 : i32
    return %c0_i32, %c0_i32_0 : i32, i32
  }
  func.func @transform_11(%arg0: i32) -> (i32, i32, i32) {
    %c0_i32 = arith.constant 0 : i32
    %c0_i32_0 = arith.constant 0 : i32
    %c0_i32_1 = arith.constant 0 : i32
    return %arg0, %c0_i32, %c0_i32_0 : i32, i32, i32
  }
  func.func @transform_12(%arg0: i32) -> (i32, i32, i32) {
    %c0_i32 = arith.constant 0 : i32
    %c0_i32_0 = arith.constant 0 : i32
    %c0_i32_1 = arith.constant 0 : i32
    return %arg0, %c0_i32, %c0_i32_0 : i32, i32, i32
  }
}

</mosaic_0001>

<bundles_post_ra>
// kernel: tpu_custom_call.1
= control target key start
LH: loop header
LB: loop body
LE: loop exit
PB: predicated region body
PF: predicated region fallthrough
CT: control target
= control target key end

     0   :  { %s3027_s0 = inlined_call_operand.hbm [shape: f32[2,8,32], index: 0, kind: input, shape index: {}]   ;;  %s3028_s1 = inlined_call_operand.hbm [shape: f32[2,8,32], index: 1, kind: input, shape index: {}]   ;;  %s3029_s2 = inlined_call_operand.hbm [shape: f32[2,8,32], index: 2, kind: input, shape index: {}]   ;;  %s3030_s3 = inlined_call_operand.hbm [shape: f32[32,32], index: 3, kind: input, shape index: {}]   ;;  %s3031_s4 = inlined_call_operand.hbm [shape: f32[32,32], index: 4, kind: input, shape index: {}]   ;;  %s3032_s5 = inlined_call_operand.hbm [shape: f32[32,32], index: 5, kind: input, shape index: {}]   ;;  %s3033_s6 = inlined_call_operand.vmem [shape: f32[1,32], index: 6, kind: input, shape index: {}]   ;;  %s3034_s7 = inlined_call_operand.vmem [shape: f32[1,32], index: 7, kind: input, shape index: {}]   ;;  %s3035_s8 = inlined_call_operand.hbm [shape: f32[1,32], index: 8, kind: input, shape index: {}]   ;;  %s3036_s9 = inlined_call_operand.vmem [shape: f32[32,32], index: 9, kind: input, shape index: {}]   ;;  %s3037_s10 = inlined_call_operand.vmem [shape: f32[1,32], index: 10, kind: input, shape index: {}]   ;;  %s3038_s11 = inlined_call_operand.hbm [shape: f32[2,8,32], index: 11, kind: output, shape index: {0}]   ;;  %s3039_s12 = inlined_call_operand.hbm [shape: f32[2,8,8], index: 12, kind: output, shape index: {1}]  }
   0x1   :  { %3065 = sst [smem:[#allocation30_spill]] %s3028_s1 }
   0x2   :  { %3066 = sst [smem:[#allocation31_spill]] %s3030_s3 }
   0x3   :  { %3067 = sst [smem:[#allocation32_spill]] %s3032_s5 }
   0x4   :  { %3068 = sst [smem:[#allocation33_spill]] %s3033_s6 }
   0x5   :  { %3069 = sst [smem:[#allocation34_spill]] %s3036_s9 }
   0x6   :  { %3070 = sst [smem:[#allocation35_spill]] %s3037_s10 }
   0x7   :  { %3071 = sst [smem:[#allocation36_spill]] %s3038_s11 }
   0x8   :  { %3072 = sst [smem:[#allocation37_spill]] %s3039_s12 }
   0x9   :  { %18 = vsyncpa [#allocation4], 0 }
   0xa   :  { %20 = vsyncpa [#allocation4 + $0x1], 0 }
   0xb   :  { %21 = vsyncpa [#allocation7], 0 }
   0xc   :  { %23 = vsyncpa [#allocation7 + $0x1], 0 }
   0xd   :  { %24 = vsyncpa [#allocation10], 0 }
   0xe   :  { %25 = vsyncpa [#allocation13], 0 }
   0xf   :  { %26 = vsyncpa [#allocation5], 0 }
  0x10   :  { %28 = vsyncpa [#allocation5 + $0x1], 0 }
  0x11   :  { %29 = vsyncpa [#allocation17], 0 }
  0x12   :  { %31 = vsyncpa [#allocation17 + $0x1], 0  ;;  %s2527_s21 = smov 0   ;;  %s2529_s22 = smov 0  }
  0x13   :  { %s2531_s23 = smov 0   ;;  %s2533_s24 = smov 0  }
  0x14 LB: > { %3073 = sst [smem:[#allocation24_spill]] %s2428_s21  ;;  %s2442_s25 = smov [#allocation9]   ;;  %s2440_s24 = sphi %s2533_s24, %s3116_s24   ;;  %s2436_s23 = sphi %s2531_s23, %s3120_s23   ;;  %s2432_s22 = sphi %s2529_s22, %s3119_s22   ;;  %s2428_s21 = sphi %s2527_s21, %s3118_s21  }
  0x15   : > { %3074 = sst [smem:[#allocation25_spill]] %s2440_s24  ;;  %s352_s26 = sshll.u32 %s2442_s25, 4  ;;  %s2553_s26 = int_to_ptr.vmem [resolvable:$true] %s352_s26 }
  0x16   : > { %s2548_s27 = sadd.s32 4294967295, %s2440_s24   ;;  %p1807_p0 = scmp.ge.s32.totalorder %s2440_s24, 1 }
  0x17   : > { %p3051_p1 = scmp.eq.s32.totalorder %s2548_s27, 0  ;;  %p340_p2 = scmp.lt.s32.totalorder %s2440_s24, 3 }
  0x18   : > { %s2443_s29 = smov [#allocation12]   ;;  %s3077_s3 = sld [smem:[#allocation31_spill]] }
  0x19   : > { %p2555_p3 = pnand %p1807_p0, %p340_p2  ;;  %s378_s30 = sshll.u32 %s2443_s29, 4  ;;  %s2568_s30 = int_to_ptr.vmem [resolvable:$true] %s378_s30 }
  0x1b   : > { %s3075_s28 = scalar_select %p2555_p3, 1, 0 }
  0x1c   : > { %p2025_p5 = pneg %p2555_p3 }
  0x1e   : > { %p2564_p6 = pnand %p2025_p5, %p3051_p1  ;;  %s2128_s16 = scalar_lea.hbm %s3077_s3, 512 }
  0x1f   : > { %p2129_p7 = scmp.ne.s32.totalorder %s3077_s3, %s2128_s16  ;;  %p2135_p11 = scmp.lt.u32.totalorder %s2128_s16, %s3077_s3 }
  0x20   : > { %s3076_s13 = scalar_select %p2564_p6, 1, 0 }
  0x21   : > { %p2578_p8 = pneg %p2564_p6 }
  0x23   : > { %s3078_s19 = scalar_select %p2578_p8, 1, 0 }
  0x24   : > { %p2131_p9 = pnand %p2578_p8, %p2129_p7 }
  0x26   : > { %p2132_p10 = pneg %p2131_p9 }
  0x28   : > { %p2137_p12 = pnand %p2135_p11, %p2132_p10 }
  0x2a   : > { %2140 = shalt.err (!%p2137_p12)
}
  0x2b   : > { %s2141_s29 = scalar_lea.vmem %s2553_s26, 512  ;;  %p2149_p5 = scmp.lt.s32.totalorder %s2553_s26, %s2553_s26 }
  0x2c   : > { %p2142_p13 = scmp.ne.s32.totalorder %s2553_s26, %s2141_s29  ;;  %p2150_p4 = scmp.lt.s32.totalorder %s2141_s29, %s2141_s29 }
  0x2e   : > { %p2144_p0 = pnand %p2142_p13, %p2578_p8  ;;  %p2151_p7 = por %p2150_p4, %p2149_p5 }
  0x30   : > { %p2145_p2 = pneg %p2144_p0 }
  0x32   : > { %p2152_p9 = pnand %p2151_p7, %p2145_p2 }
  0x34   : > { %2155 = shalt.err (!%p2152_p9)
}
  0x35   : > { %s3043_s14 = smov 128   ;;  %s3044_s15 = smov 8  }
  0x36   : > { %2028 = dma.hbm_to_vmem [thread:$0]  (!%p2564_p6), %s3077_s3, 512, %s2553_s26, [#allocation10], %s3043_s14, %s3043_s14, %s3044_s15  }
  0x37   : > { %s3079_s5 = sld [smem:[#allocation32_spill]] }
  0x3d   : > { %s2156_s25 = scalar_lea.hbm %s3079_s5, 512 }
  0x3e   : > { %p2157_p4 = scmp.ne.s32.totalorder %s3079_s5, %s2156_s25  ;;  %p2163_p12 = scmp.lt.u32.totalorder %s2156_s25, %s3079_s5 }
  0x40   : > { %p2159_p10 = pnand %p2157_p4, %p2578_p8 }
  0x42   : > { %p2160_p11 = pneg %p2159_p10 }
  0x44   : > { %p2165_p13 = pnand %p2163_p12, %p2160_p11 }
  0x46   : > { %2168 = shalt.err (!%p2165_p13)
}
  0x47   : > { %s2169_s26 = scalar_lea.vmem %s2568_s30, 512  ;;  %p2177_p7 = scmp.lt.s32.totalorder %s2568_s30, %s2568_s30 }
  0x48   : > { %p2170_p0 = scmp.ne.s32.totalorder %s2568_s30, %s2169_s26  ;;  %p2178_p9 = scmp.lt.s32.totalorder %s2169_s26, %s2169_s26 }
  0x4a   : > { %p2172_p2 = pnand %p2170_p0, %p2578_p8  ;;  %p2179_p4 = por %p2178_p9, %p2177_p7 }
  0x4c   : > { %p2173_p5 = pneg %p2172_p2 }
  0x4e   : > { %p2180_p10 = pnand %p2179_p4, %p2173_p5 }
  0x50   : > { %2183 = shalt.err (!%p2180_p10)
}
  0x51   : > { %2034 = dma.hbm_to_vmem [thread:$0]  (!%p2564_p6), %s3079_s5, 512, %s2568_s30, [#allocation13], %s3043_s14, %s3043_s14, %s3044_s15  }
  0x52   : > { %s1806_s12 = sadd.s32 4294967294, %s2440_s24   ;;  %s2630_s16 = sadd.s32 1, %s2440_s24  }
  0x53   : > { %3080 = sst [smem:[#allocation26_spill]] %s2630_s16  ;;  %s41_s17 = ssub.s32 %s2440_s24, %s2630_s16 }
  0x54   : > { %s44_s18 = sadd.s32 1, %s2436_s23  ;;  %p42_p11 = scmp.eq.s32.totalorder %s41_s17, 0 }
  0x55   : > { %p51_p12 = scmp.ne.s32.totalorder %s2436_s23, %s2432_s22  ;;  %p52_p13 = scmp.eq.s32.totalorder %s2440_s24, 0 }
  0x56   : > { %p57_p0 = scmp.ne.s32.totalorder %s2432_s22, %s2428_s21  ;;  %p301_p7 = scmp.eq.s32.totalorder %s2548_s27, 1 }
  0x57   : > { %s2641_s20 = scalar_select %p42_p11, %s2436_s23, %s44_s18  }
  0x58   : > { %p53_p2 = por %p52_p13, %p51_p12  ;;  %p2645_p5 = por %p3051_p1, %p57_p0 }
  0x59   : > { %3081 = sst [smem:[#allocation27_spill]] %s2641_s20  ;;  %p307_p9 = scmp.eq.s32.totalorder %s1806_s12, 1 }
  0x5a   : > { %s3082_s25 = scalar_select %p2645_p5, 1, 0 }
  0x5b   : > { %p2059_p4 = scmp.lt.s32.totalorder %s2440_s24, 2  ;;  %s3045_s30 = sand.u32 1, %s2436_s23  }
  0x5c   : > { %p2652_p10 = por %p301_p7, %p51_p12  ;;  %p2656_p3 = por %p307_p9, %p57_p0 }
  0x5d   : > { %s2662_s10 = sshll.u32 %s3045_s30, 3  ;;  %s2665_s11 = sshll.u32 %s2440_s24, 7 }
  0x5e   : > { %s3083_s29 = scalar_select %p2652_p10, 1, 0 }
  0x5f   : > { %s3085_s26 = scalar_select %p2656_p3, 1, 0 }
  0x60   : > { %3084 = sst [smem:[#allocation28_spill]] %s3083_s29  ;;  %p2667_p11 = pnand %p2059_p4, %p53_p2 }
  0x61   : > { %3086 = sst [smem:[#allocation29_spill]] %s3085_s26  ;;  %s433_s12 = sand.u32 1, %s2440_s24  }
  0x62   : > { %s3087_s17 = scalar_select %p2667_p11, 1, 0 }
  0x63   : > { %s3088_s1 = sld [smem:[#allocation30_spill]]  ;;  %s437_s30 = scalar_lea.vmem [#allocation6], %s2662_s10 }
  0x64   : > { %s444_s3 = sshll.u32 %s437_s30, 4  ;;  %s2446_s5 = smov [#allocation11]   ;;  %s2679_s3 = int_to_ptr.vmem [resolvable:$true] %s444_s3 }
  0x65   : > { %s2681_s20 = sshll.u32 %s2446_s5, 4  ;;  %s2683_s16 = scalar_lea.sflag [#allocation7], %s433_s12  ;;  %s366_s20 = int_to_ptr.vmem [resolvable:$true] %s2681_s20 }
  0x66   : > { %p2689_p13 = pneg %p2667_p11 }
  0x68   : > { %s3089_s14 = scalar_select %p2689_p13, 1, 0 }
  0x69   : > { %s2676_s15 = scalar_lea.hbm %s3088_s1, %s2665_s11  ;;  %s2189_s24 = scalar_lea.hbm %s3088_s1, 256 }
  0x6a   : > { %s2184_s26 = scalar_lea.hbm %s2676_s15, 128  ;;  %p2190_p7 = scmp.lt.u32.totalorder %s2676_s15, %s3088_s1 }
  0x6b   : > { %p2185_p12 = scmp.ne.s32.totalorder %s2676_s15, %s2184_s26  ;;  %p2191_p9 = scmp.lt.u32.totalorder %s2189_s24, %s2184_s26 }
  0x6c   : > { %p2193_p1 = scmp.lt.u32.totalorder %s2184_s26, %s2676_s15 }
  0x6d   : > { %p2187_p0 = pnand %p2689_p13, %p2185_p12  ;;  %p2192_p4 = por %p2191_p9, %p2190_p7 }
  0x6f   : > { %p2188_p2 = pneg %p2187_p0  ;;  %p2194_p3 = por %p2193_p1, %p2192_p4 }
  0x71   : > { %p2195_p10 = pnand %p2194_p3, %p2188_p2 }
  0x73   : > { %2198 = shalt.err (!%p2195_p10)
}
  0x74   : > { %s2199_s12 = scalar_lea.vmem %s2679_s3, 128  ;;  %s2447_s18 = smov [#allocation6]  }
  0x75   : > { %p2200_p12 = scmp.ne.s32.totalorder %s2679_s3, %s2199_s12  ;;  %s2204_s30 = sshll.u32 %s2447_s18, 4  ;;  %s2205_s30 = int_to_ptr.vmem [resolvable:$false] %s2204_s30 }
  0x76   : > { %s2206_s21 = scalar_lea.vmem %s2205_s30, 256  ;;  %p2207_p6 = scmp.lt.s32.totalorder %s2679_s3, %s2205_s30 }
  0x77   : > { %p2202_p0 = pnand %p2200_p12, %p2689_p13  ;;  %p2208_p8 = scmp.lt.s32.totalorder %s2206_s21, %s2199_s12 }
  0x79   : > { %p2203_p5 = pneg %p2202_p0  ;;  %p2209_p7 = por %p2208_p8, %p2207_p6 }
  0x7b   : > { %p2210_p9 = pnand %p2209_p7, %p2203_p5 }
  0x7d   : > { %2213 = shalt.err (!%p2210_p9)
}
  0x7e   : > { %2044 = dma.hbm_to_vmem [thread:$0]  (!%p2667_p11), %s2676_s15, 128, %s2679_s3, %s2683_s16  }
  0x7f   : > { %s2214_s5 = scalar_lea.hbm %s3031_s4, 512  ;;  %p3090_p3 = scmp.ne.s32.totalorder %s3078_s19, 0 }
  0x80   : > { %p2215_p1 = scmp.ne.s32.totalorder %s3031_s4, %s2214_s5  ;;  %p2221_p5 = scmp.lt.u32.totalorder %s2214_s5, %s3031_s4 }
  0x82   : > { %p2217_p6 = pnand %p2215_p1, %p3090_p3 }
  0x84   : > { %p2218_p8 = pneg %p2217_p6 }
  0x86   : > { %p2223_p10 = pnand %p2221_p5, %p2218_p8 }
  0x88   : > { %2226 = shalt.err (!%p2223_p10)
}
  0x89   : > { %s2227_s21 = scalar_lea.vmem %s366_s20, 512  ;;  %p2235_p0 = scmp.lt.s32.totalorder %s366_s20, %s366_s20 }
  0x8a   : > { %p2228_p2 = scmp.ne.s32.totalorder %s366_s20, %s2227_s21  ;;  %p2236_p7 = scmp.lt.s32.totalorder %s2227_s21, %s2227_s21 }
  0x8c   : > { %p2230_p4 = pnand %p2228_p2, %p3090_p3  ;;  %p2237_p9 = por %p2236_p7, %p2235_p0 }
  0x8e   : > { %p2231_p12 = pneg %p2230_p4 }
  0x90   : > { %p2238_p11 = pnand %p2237_p9, %p2231_p12 }
  0x92   : > { %2241 = shalt.err (!%p2238_p11)
}
  0x93   : > { %p3091_p1 = scmp.ne.s32.totalorder %s3076_s13, 0  ;;  %s3092_s1 = smov 8  }
  0x94   : > { %s3093_s3 = smov 128   ;;  %s2448_s26 = smov [#allocation14]  }
  0x95   : > { %2031 = dma.hbm_to_vmem [thread:$0]  (!%p3091_p1), %s3031_s4, 512, %s366_s20, [#allocation10], %s3093_s3, %s3093_s3, %s3092_s1  }
  0x96   : > { %s398_s5 = sshll.u32 %s2448_s26, 4  ;;  %s2242_s30 = scalar_lea.hbm %s3035_s8, 16  ;;  %s399_s5 = int_to_ptr.vmem [resolvable:$true] %s398_s5 }
  0x97   : > { %p2243_p11 = scmp.ne.s32.totalorder %s3035_s8, %s2242_s30  ;;  %p2249_p5 = scmp.lt.u32.totalorder %s2242_s30, %s3035_s8 }
  0x99   : > { %p2245_p6 = pnand %p2243_p11, %p3090_p3 }
  0x9b   : > { %p2246_p8 = pneg %p2245_p6 }
  0x9d   : > { %p2251_p10 = pnand %p2249_p5, %p2246_p8 }
  0x9f   : > { %2254 = shalt.err (!%p2251_p10)
}
  0xa0   : > { %s2255_s20 = scalar_lea.vmem %s399_s5, 16  ;;  %s2262_s1 = scalar_lea.vmem %s399_s5, 32 }
  0xa1   : > { %p2256_p2 = scmp.ne.s32.totalorder %s399_s5, %s2255_s20  ;;  %p2263_p0 = scmp.lt.s32.totalorder %s399_s5, %s399_s5 }
  0xa2   : > { %p2264_p7 = scmp.lt.s32.totalorder %s2262_s1, %s2255_s20 }
  0xa3   : > { %p2258_p4 = pnand %p2256_p2, %p3090_p3 }
  0xa4   : > { %p2265_p9 = por %p2264_p7, %p2263_p0 }
  0xa5   : > { %p2259_p12 = pneg %p2258_p4 }
  0xa7   : > { %p2266_p13 = pnand %p2265_p9, %p2259_p12 }
  0xa9   : > { %2269 = shalt.err (!%p2266_p13)
}
  0xaa   : > { %2037 = dma.hbm_to_vmem [thread:$0]  (!%p3091_p1), %s3035_s8, 16, %s399_s5, [#allocation13]  }
  0xab   : > { %s2757_s19 = scalar_lea.hbm %s3027_s0, %s2665_s11  ;;  %s419_s15 = scalar_lea.vmem [#allocation3], %s2662_s10 }
  0xac   : > { %s426_s24 = sshll.u32 %s419_s15, 4  ;;  %s3094_s13 = sand.u32 1, %s2436_s23   ;;  %s427_s24 = int_to_ptr.vmem [resolvable:$true] %s426_s24 }
  0xad   : > { %s416_s26 = scalar_lea.sflag [#allocation4], %s3094_s13  ;;  %s2270_s18 = scalar_lea.hbm %s2757_s19, 128 }
  0xae   : > { %p2271_p13 = scmp.ne.s32.totalorder %s2757_s19, %s2270_s18  ;;  %p3095_p3 = scmp.ne.s32.totalorder %s3089_s14, 0 }
  0xaf   : > { %s2275_s30 = scalar_lea.hbm %s3027_s0, 256  ;;  %p2276_p1 = scmp.lt.u32.totalorder %s2757_s19, %s3027_s0 }
  0xb0   : > { %p2273_p11 = pnand %p2271_p13, %p3095_p3  ;;  %p2277_p8 = scmp.lt.u32.totalorder %s2275_s30, %s2270_s18 }
  0xb1   : > { %p2279_p10 = scmp.lt.u32.totalorder %s2270_s18, %s2757_s19 }
  0xb2   : > { %p2274_p6 = pneg %p2273_p11  ;;  %p2278_p5 = por %p2277_p8, %p2276_p1 }
  0xb4   : > { %p2280_p2 = por %p2279_p10, %p2278_p5 }
  0xb6   : > { %p2281_p4 = pnand %p2280_p2, %p2274_p6 }
  0xb8   : > { %2284 = shalt.err (!%p2281_p4)
}
  0xb9   : > { %s2285_s1 = scalar_lea.vmem %s427_s24, 128  ;;  %s2449_s29 = smov [#allocation3]  }
  0xba   : > { %p2286_p12 = scmp.ne.s32.totalorder %s427_s24, %s2285_s1  ;;  %s2290_s3 = sshll.u32 %s2449_s29, 4  ;;  %s2291_s3 = int_to_ptr.vmem [resolvable:$false] %s2290_s3 }
  0xbb   : > { %s2292_s6 = scalar_lea.vmem %s2291_s3, 256  ;;  %p2293_p9 = scmp.lt.s32.totalorder %s427_s24, %s2291_s3 }
  0xbc   : > { %p2288_p0 = pnand %p2286_p12, %p3095_p3  ;;  %p2294_p13 = scmp.lt.s32.totalorder %s2292_s6, %s2285_s1 }
  0xbe   : > { %p2289_p7 = pneg %p2288_p0  ;;  %p2295_p11 = por %p2294_p13, %p2293_p9 }
  0xc0   : > { %p2296_p1 = pnand %p2295_p11, %p2289_p7 }
  0xc2   : > { %2299 = shalt.err (!%p2296_p1)
}
  0xc3   : > { %p3096_p8 = scmp.ne.s32.totalorder %s3087_s17, 0  ;;  %s2783_s13 = scalar_lea.hbm %s3029_s2, %s2665_s11 }
  0xc4   : > { %s455_s18 = scalar_lea.vmem [#allocation8], %s2662_s10  ;;  %s2300_s12 = scalar_lea.hbm %s2783_s13, 128 }
  0xc5   : > { %2041 = dma.hbm_to_vmem [thread:$0]  (!%p3096_p8), %s2757_s19, 128, %s427_s24, %s416_s26  }
  0xc6   : > { %s462_s5 = sshll.u32 %s455_s18, 4  ;;  %p2301_p6 = scmp.ne.s32.totalorder %s2783_s13, %s2300_s12  ;;  %s463_s5 = int_to_ptr.vmem [resolvable:$true] %s462_s5 }
  0xc7   : > { %s2305_s19 = scalar_lea.hbm %s3029_s2, 256  ;;  %p2306_p2 = scmp.lt.u32.totalorder %s2783_s13, %s3029_s2 }
  0xc8   : > { %p2303_p5 = pnand %p2301_p6, %p3095_p3  ;;  %p2307_p4 = scmp.lt.u32.totalorder %s2305_s19, %s2300_s12 }
  0xc9   : > { %p2309_p0 = scmp.lt.u32.totalorder %s2300_s12, %s2783_s13 }
  0xca   : > { %p2304_p10 = pneg %p2303_p5  ;;  %p2308_p12 = por %p2307_p4, %p2306_p2 }
  0xcc   : > { %p2310_p7 = por %p2309_p0, %p2308_p12 }
  0xce   : > { %p2311_p9 = pnand %p2310_p7, %p2304_p10 }
  0xd0   : > { %2314 = shalt.err (!%p2311_p9)
}
  0xd1   : > { %s2315_s10 = scalar_lea.vmem %s463_s5, 128  ;;  %s2450_s11 = smov [#allocation8]  }
  0xd2   : > { %p2316_p13 = scmp.ne.s32.totalorder %s463_s5, %s2315_s10  ;;  %s2320_s20 = sshll.u32 %s2450_s11, 4  ;;  %s2321_s20 = int_to_ptr.vmem [resolvable:$false] %s2320_s20 }
  0xd3   : > { %s2322_s1 = scalar_lea.vmem %s2321_s20, 256  ;;  %p2323_p6 = scmp.lt.s32.totalorder %s463_s5, %s2321_s20 }
  0xd4   : > { %p2318_p11 = pnand %p2316_p13, %p3095_p3  ;;  %p2324_p5 = scmp.lt.s32.totalorder %s2322_s1, %s2315_s10 }
  0xd6   : > { %p2319_p1 = pneg %p2318_p11  ;;  %p2325_p8 = por %p2324_p5, %p2323_p6 }
  0xd8   : > { %p2326_p2 = pnand %p2325_p8, %p2319_p1 }
  0xda   : > { %2329 = shalt.err (!%p2326_p2)
}
  0xdb   : > { %p3097_p4 = scmp.ne.s32.totalorder %s3087_s17, 0  ;;  %p3098_p10 = scmp.ne.s32.totalorder %s3075_s28, 0 }
  0xdc   : > { %s2807_s14 = sand.u32 (!%p3098_p10), 1, %s2432_s22   ;;  %p3099_p3 = scmp.ne.s32.totalorder (!%p3098_p10), %s3082_s25, 0 }
  0xdd   : > { %2047 = dma.hbm_to_vmem [thread:$0]  (!%p3097_p4), %s2783_s13, 128, %s463_s5, %s2683_s16  }
  0xde   : > { %471 = sbr.rel (%p3098_p10) target bundleno = 2150 (0x866), region = 64  ;;  %s2810_s29 = sshll.u32 (!%p3098_p10), %s2807_s14, 3 }
  0xdf   : > { %s474_s3 = scalar_lea.sflag (!%p3098_p10), [#allocation4], %s2807_s14  ;;  %s477_s6 = scalar_lea.vmem (!%p3098_p10), [#allocation3], %s2810_s29 }
  0xe5   : > { %2403 = dma.done.wait (%p3099_p3), %s474_s3, 128  }
  0xe6   : > { %2405 = vsyncadd (%p3099_p3), %s474_s3, 4294967168  ;;  %s482_s28 = sand.u32 1, %s2548_s27   ;;  %s486_s17 = scalar_lea.vmem [#allocation6], %s2810_s29 }
  0xe7   : > { %s483_s16 = scalar_lea.sflag [#allocation7], %s482_s28 }
  0xe8   : > { %2407 = dma.done.wait (%p3099_p3), %s483_s16, 256  }
  0xe9   : > { %2409 = vsyncadd (%p3099_p3), %s483_s16, 4294967040  ;;  %s495_s9 = scalar_lea.vmem [#allocation8], %s2810_s29  ;;  %p3100_p8 = scmp.eq.s32.totalorder %s2548_s27, 0 }
  0xeb   : > { %2411 = dma.done.wait (%p3100_p8), [#allocation10], 1024   ;;  %p3101_p12 = pmov %p3100_p8 }
  0xec   : > { %p3102_p0 = pmov %p3100_p8 }
  0xed   : > { %2413 = vsyncadd (%p3101_p12), [#allocation10], 4294966272 }
  0xee   : > { %2415 = dma.done.wait (%p3102_p0), [#allocation13], 528   ;;  %p3103_p7 = pmov %p3102_p0 }
  0xef   : > { %v2451_v0 = vmov 0.0|0.0   ;;  %vm2452_vm0 = vmmov 0   ;;  %v2453_v1 = vmov 0.0   ;;  %v655_v2 = vld [vmem:[#allocation11] sm:$0xff]  ;;  %v656_v3 = vld [vmem:[#allocation11 + $0x8] sm:$0xff]  ;;  %v657_v7 = vld [vmem:[#allocation11 + $0x10] sm:$0xff] }
  0xf0   : > { %2417 = vsyncadd (%p3103_p7), [#allocation13], 4294966768  ;;  %1981 = vmatprep.subr.bf16.mxu1 %v2451_v0  ;;  %1975 = vmatprep.subr.bf16.mxu0 %v2451_v0  ;;  %v570_v4 = vld [vmem:[#allocation9] sm:$0xff]  ;;  %v1982_v5 = vpack.c.bf16 %v656_v3, %v655_v2  ;;  %v571_v6 = vld [vmem:[#allocation9 + $0x8] sm:$0xff]  ;;  %vm581_vm1 = vcmask 261120   ;;  %s3104_s5 = sld [smem:[#allocation33_spill]] }
  0xf1   : > { %1910 = vmatprep.mubr.msk.f32.mxu1 %vm2452_vm0, %v2453_v1  ;;  %1899 = vmatprep.mubr.msk.f32.mxu0 %vm2452_vm0, %v2453_v1  ;;  %v658_v8 = vld [vmem:[#allocation11 + $0x18] sm:$0xff]  ;;  %v1976_v9 = vpack.c.bf16 %v571_v6, %v570_v4  ;;  %v572_v10 = vld [vmem:[#allocation9 + $0x10] sm:$0xff]  ;;  %v568_v14 = vld [vmem:[%s486_s17] sm:$0xff]  ;;  %vm823_vm2 = vcmask 64512   ;;  %s2454_s12 = smov 120   ;;  %s2455_s30 = smov 112  }
  0xf2   : > { %v573_v11 = vld [vmem:[#allocation9 + $0x18] sm:$0xff]  ;;  %1983 = vmatpush3.bf16.msra.mxu1 %v1982_v5  ;;  %v1985_v12 = vpack.c.bf16 %v658_v8, %v657_v7  ;;  %v1831_v16 = vld [vmem:[%s3034_s7] ss:$0 sm:$0xff]  ;;  %s2456_s21 = smov 104   ;;  %v739_v24 = vld [vmem:[#allocation12] sm:$0xff]  ;;  %s566_s19 = scalar_lea.vmem [#allocation16], %s2810_s29 }
  0xf3   : > { %1977 = vmatpush3.bf16.msra.mxu0 %v1976_v9  ;;  %1984 = vmatprep.subr.bf16.mxu1 %v2451_v0  ;;  %v1979_v13 = vpack.c.bf16 %v573_v11, %v572_v10  ;;  %v567_v15 = vld [vmem:[%s477_s6] sm:$0xff]  ;;  %v740_v25 = vld [vmem:[#allocation12 + $0x8] sm:$0xff]  ;;  %v1833_v39 = vld [vmem:[#allocation14] ss:$0 sm:$0xff]  ;;  %s3105_s10 = sld [smem:[#allocation34_spill]]  ;;  %s2457_s16 = smov 8  }
  0xf4   : > { %1978 = vmatprep.subr.bf16.mxu0 %v2451_v0  ;;  %v741_v26 = vld [vmem:[#allocation12 + $0x10] sm:$0xff]  ;;  %v1988_v27 = vpack.c.bf16 %v740_v25, %v739_v24  ;;  %v742_v28 = vld [vmem:[#allocation12 + $0x18] sm:$0xff]  ;;  %s2458_s17 = smov 16   ;;  %vm1157_vm3 = vcmask 130112   ;;  %s3106_s25 = sld [smem:[#allocation28_spill]]  ;;  %vm1329_vm4 = vcmask 195712  }
  0xf5   : > { %v1991_v29 = vpack.c.bf16 %v742_v28, %v741_v26  ;;  %v569_v30 = vld [vmem:[%s495_s9] sm:$0xff]  ;;  %s2459_s9 = smov 24   ;;  %vm1501_vm5 = vcmask 261312   ;;  %s1851_s15 = sshll.u32 %s2548_s27, 7 }
  0xf6   : > { %1986 = vmatpush3.bf16.msra.mxu1 %v1985_v12  ;;  %v1829_v17 = vld [vmem:[%s3104_s5] ss:$0 sm:$0xff]  ;;  %s3107_s5 = sld [smem:[#allocation37_spill]]  ;;  %s2460_s26 = smov [#allocation16]  }
  0xf7   : > { %1980 = vmatpush3.bf16.msra.mxu0 %v1979_v13  ;;  %1924 = vmatprep.subr.mxu1 %v2453_v1  ;;  %s2334_s11 = sshll.u32 %s2460_s26, 4  ;;  %s2335_s11 = int_to_ptr.vmem [resolvable:$false] %s2334_s11 }
  0xf8   : > { %1987 = vmatprep.subr.bf16.mxu0 %v2451_v0  ;;  %s2336_s20 = scalar_lea.vmem %s2335_s11, 256 }
  0xf9   : > { %1911 = vmatmul.mubr.msk.f32.vlgmr.msra.gmra.mrb[0].mxu1 %vm581_vm1, %v568_v14 }
  0xfa   : > { %1900 = vmatmul.mubr.msk.f32.vlgmr.msra.gmra.mrb[0].mxu0 %vm581_vm1, %v567_v15  ;;  %1926 = vmatprep.mubr.msk.f32.mxu1 %vm2452_vm0, %v2453_v1  ;;  %p3108_p13 = scmp.ne.s32.totalorder %s3106_s25, 0 }
  0xfb   : > { %1921 = vmatprep.mubr.msk.f32.mxu0 %vm2452_vm0, %v2453_v1  ;;  %1989 = vmatpush3.bf16.msra.mxu0 %v1988_v27 }
  0xfc   : > { %1990 = vmatprep.subr.bf16.mxu0 %v2451_v0 }
  0xff   : > { %1992 = vmatpush3.bf16.msra.mxu0 %v1991_v29 }
 0x100   : > { %1944 = vmatprep.subr.mxu0 %v2453_v1 }
 0x102   : > { %1922 = vmatmul.mubr.msk.f32.vlgmr.msra.gmra.mrb[2].mxu0 %vm581_vm1, %v569_v30 }
 0x103   : > { %1946 = vmatprep.mubr.msk.f32.mxu0 %vm2452_vm0, %v2453_v1 }
 0x1cc   : > { %v735_v18 = vpop.f32.mrb[0].mxu1 }
 0x1cd   : > { %v736_v19 = vadd.f32 %v1831_v16, %v735_v18  ;;  %v1912_v20 = vpop.f32.mrb[1].mxu1  ;;  %v651_v21 = vpop.f32.mrb[0].mxu0 }
 0x1ce   : > { %v652_v22 = vadd.f32 %v1829_v17, %v651_v21  ;;  %v1901_v23 = vpop.f32.mrb[1].mxu0 }
 0x1cf   : > { %988 = vrot.lane.b32.xlu1 %v736_v19, %s2454_s12  ;;  %1925 = vmatpush3.xpose.msk.msra.mxu1 %vm823_vm2, %v736_v19 }
 0x1d0   : > { %1929 = vmatprep.subr.mxu1 %v2453_v1 }
 0x1d2   : > { %1927 = vmatmul.mubr.msk.f32.vlgmr.msra.gmra.mrb[2].mxu1 %vm823_vm2, %v652_v22 }
 0x1d3   : > { %986 = vrot.lane.b32.xlu1 %v652_v22, %s2454_s12  ;;  %1931 = vmatprep.mubr.msk.f32.mxu1 %vm2452_vm0, %v2453_v1 }
 0x1d5   : > { %v819_v40 = vpop.f32.mrb[2].mxu0 }
 0x1d6   : > { %v2878_v41 = vadd.f32 %v1833_v39, %v819_v40  ;;  %v1923_v42 = vpop.f32.mrb[3].mxu0 }
 0x1d7   : > { %1159 = vrot.lane.b32.xlu1 %v652_v22, %s2455_s30 }
 0x1d8   : > { %1930 = vmatpush3.msra.mxu1 %v2878_v41 }
 0x1d9   : > { %1934 = vmatprep.subr.mxu1 %v2453_v1 }
 0x1db   : > { %1333 = vrot.lane.b32.xlu1 %v736_v19, %s2456_s21 }
 0x1df   : > { %1331 = vrot.lane.b32.xlu1 %v652_v22, %s2456_s21 }
 0x241   : > { %v989_v43 = vpop.permute.xlu1 %988 }
 0x245   : > { %v987_v44 = vpop.permute.xlu1 %986 }
 0x249   : > { %v1160_v45 = vpop.permute.xlu1 %1159 }
 0x24d   : > { %v1334_v48 = vpop.permute.xlu1 %1333 }
 0x251   : > { %v1332_v50 = vpop.permute.xlu1 %1331 }
 0x2a5   : > { %v896_v31 = vpop.f32.mrb[2].mxu1 }
 0x2a6   : > { %v1928_v32 = vpop.f32.mrb[3].mxu1  ;;  %v900_v33 = vsel %vm823_vm2, %v896_v31, -inf }
 0x2a7   : > { %901 = vmax.xlane.f32.xlu0 %v900_v33  ;;  %v1504_v32 = vld [vmem:[%s3105_s10] sm:$0xff]  ;;  %v1505_v33 = vld [vmem:[%s3105_s10 + $0x8] sm:$0xff] }
 0x334   : > { %v902_v34 = vpop.xlane.xlu0 %901 }
 0x335   : > { %v903_v35 = vsub.f32 %v896_v31, %v902_v34  ;;  %v1994_v34 = vpack.c.bf16 %v1505_v33, %v1504_v32 }
 0x337   : > { %v904_v36 = vmul.f32 1.442695, %v903_v35  ;;  %v1507_v35 = vld [vmem:[%s3105_s10 + $0x18] sm:$0xff] }
 0x339   : > { %2112 = vpow2.f32 %v904_v36 }
 0x343   : > { %v2113_v37 = vpop.eup %2112 }
 0x344   : > { %v906_v38 = vsel %vm823_vm2, %v2113_v37, 0.0 }
 0x345   : > { %907 = vadd.xlane.f32.xlu0 %v906_v38 }
 0x35b   : > { %1161 = vrot.lane.b32.xlu0 %v736_v19, %s2455_s30 }
 0x3d2   : > { %v908_v46 = vpop.xlane.xlu0 %907 }
 0x3d3   : > { %2114 = vrcp.f32 %v908_v46 }
 0x3d6   : > { %v1162_v47 = vpop.permute.xlu0 %1161 }
 0x3d7   : > { %1945 = vmatpush3.xpose.msk.msra.mxu0 %vm823_vm2, %v1162_v47 }
 0x3d8   : > { %1954 = vmatprep.subr.mxu0 %v2453_v1 }
 0x3da   : > { %1947 = vmatmul.mubr.msk.f32.vlgmr.msra.gmra.mrb[4].mxu0 %vm823_vm2, %v1160_v45 }
 0x3db   : > { %1955 = vmatpush3.xpose.msk.msra.mxu0 %vm823_vm2, %v1334_v48  ;;  %1956 = vmatprep.mubr.msk.f32.mxu0 %vm2452_vm0, %v2453_v1 }
 0x3dc   : > { %1993 = vmatprep.subr.bf16.mxu0 %v2451_v0 }
 0x3dd   : > { %v2115_v49 = vpop.eup %2114 }
 0x3de   : > { %v2890_v51 = vmul.f32 %v2115_v49, %v2113_v37  ;;  %1957 = vmatmul.mubr.msk.f32.vlgmr.msra.gmra.mrb[6].mxu0 %vm823_vm2, %v1332_v50 }
 0x3df   : > { %1972 = vmatprep.mubr.msk.f32.mxu0 %vm2452_vm0, %v2453_v1  ;;  %1995 = vmatpush3.bf16.msra.mxu0 %v1994_v34 }
 0x3e0   : > { %1932 = vmatmul.mubr.msk.f32.vlgmr.msra.gmra.mrb[4].mxu1 %vm823_vm2, %v2890_v51  ;;  %1996 = vmatprep.subr.bf16.mxu0 %v2451_v0 }
 0x3e1   : > { %1935 = vmatpush3.xpose.msk.msra.mxu1 %vm823_vm2, %v989_v43  ;;  %1936 = vmatprep.mubr.msk.f32.mxu1 %vm2452_vm0, %v2453_v1 }
 0x3e2   : > { %1939 = vmatprep.subr.mxu1 %v2453_v1 }
 0x3e4   : > { %1937 = vmatmul.mubr.msk.f32.vlgmr.msra.gmra.mrb[6].mxu1 %vm823_vm2, %v987_v44 }
 0x3e5   : > { %1941 = vmatprep.mubr.msk.f32.mxu1 %vm2452_vm0, %v2453_v1 }
 0x4ad   : > { %v1233_v52 = vpop.f32.mrb[4].mxu0 }
 0x4ae   : > { %v1948_v53 = vpop.f32.mrb[5].mxu0  ;;  %v1237_v54 = vsel %vm823_vm2, %v1233_v52, -inf }
 0x4af   : > { %1238 = vmax.xlane.f32.xlu0 %v1237_v54 }
 0x4b1   : > { %v1405_v55 = vpop.f32.mrb[6].mxu0 }
 0x4b2   : > { %v1958_v56 = vpop.f32.mrb[7].mxu0  ;;  %v1409_v62 = vsel %vm823_vm2, %v1405_v55, -inf }
 0x4b3   : > { %v981_v57 = vpop.f32.mrb[4].mxu1 }
 0x4b4   : > { %985 = vst.msk [vmem:[#allocation2] sm:$0xff] %vm823_vm2, %v981_v57  ;;  %v1933_v58 = vpop.f32.mrb[5].mxu1 }
 0x4b7   : > { %v1060_v59 = vpop.f32.mrb[6].mxu1 }
 0x4b8   : > { %v1938_v60 = vpop.f32.mrb[7].mxu1  ;;  %v1064_v61 = vsel %vm823_vm2, %v1060_v59, -inf }
 0x4b9   : > { %1065 = vmax.xlane.f32.xlu1 %v1064_v61 }
 0x4bd   : > { %1410 = vmax.xlane.f32.xlu1 %v1409_v62 }
 0x53c   : > { %v1239_v63 = vpop.xlane.xlu0 %1238 }
 0x53d   : > { %v1240_v2 = vsub.f32 %v1233_v52, %v1239_v63 }
 0x53f   : > { %v1241_v3 = vmul.f32 1.442695, %v1240_v2 }
 0x541   : > { %2116 = vpow2.f32 %v1241_v3 }
 0x546   : > { %v1066_v4 = vpop.xlane.xlu1 %1065 }
 0x547   : > { %v1067_v12 = vsub.f32 %v1060_v59, %v1066_v4 }
 0x549   : > { %v1068_v13 = vmul.f32 1.442695, %v1067_v12 }
 0x54a   : > { %v1411_v5 = vpop.xlane.xlu1 %1410 }
 0x54b   : > { %v2117_v6 = vpop.eup %2116  ;;  %v1412_v7 = vsub.f32 %v1405_v55, %v1411_v5 }
 0x54c   : > { %v1243_v8 = vsel %vm823_vm2, %v2117_v6, 0.0 }
 0x54d   : > { %v1413_v9 = vmul.f32 1.442695, %v1412_v7  ;;  %1244 = vadd.xlane.f32.xlu0 %v1243_v8 }
 0x54f   : > { %2118 = vpow2.f32 %v1413_v9 }
 0x550   : > { %2120 = vpow2.f32 %v1068_v13 }
 0x559   : > { %v2119_v10 = vpop.eup %2118 }
 0x55a   : > { %v1415_v11 = vsel %vm823_vm2, %v2119_v10, 0.0  ;;  %v2121_v14 = vpop.eup %2120 }
 0x55b   : > { %1416 = vadd.xlane.f32.xlu1 %v1415_v11  ;;  %v1070_v15 = vsel %vm823_vm2, %v2121_v14, 0.0 }
 0x563   : > { %1077 = vrot.lane.b32.xlu0 %v2878_v41, %s2454_s12  ;;  %s2951_s12 = scalar_lea.hbm %s3107_s5, %s1851_s15 }
 0x56c   : > { %1249 = vrot.lane.b32.xlu1 %v2878_v41, %s2455_s30  ;;  %s1623_s30 = sshll.u32 %s566_s19, 4  ;;  %s1624_s30 = int_to_ptr.vmem [resolvable:$true] %s1623_s30 }
 0x56d   : > { %s2330_s24 = scalar_lea.vmem %s1624_s30, 128  ;;  %p2337_p6 = scmp.lt.s32.totalorder %s1624_s30, %s2335_s11 }
 0x56e   : > { %p2331_p9 = scmp.ne.s32.totalorder %s1624_s30, %s2330_s24  ;;  %p2338_p5 = scmp.lt.s32.totalorder %s2336_s20, %s2330_s24 }
 0x570   : > { %p2332_p11 = pnand %p2331_p9, %p3108_p13  ;;  %p2339_p2 = por %p2338_p5, %p2337_p6 }
 0x572   : > { %p2333_p1 = pneg %p2332_p11 }
 0x574   : > { %p2340_p4 = pnand %p2339_p2, %p2333_p1 }
 0x590   : > { %1071 = vadd.xlane.f32.xlu1 %v1070_v15 }
 0x5a1   : > { %1421 = vrot.lane.b32.xlu1 %v2878_v41, %s2456_s21  ;;  %s1597_s21 = scalar_lea.sflag [#allocation17], %s2807_s14 }
 0x5da   : > { %v1245_v16 = vpop.xlane.xlu0 %1244 }
 0x5db   : > { %2122 = vrcp.f32 %v1245_v16 }
 0x5de   : > { %v1078_v17 = vpop.permute.xlu0 %1077 }
 0x5df   : > { %1940 = vmatpush3.msra.mxu1 %v1078_v17 }
 0x5e0   : > { %1949 = vmatprep.subr.mxu1 %v2453_v1 }
 0x5e5   : > { %v2123_v21 = vpop.eup %2122 }
 0x5e6   : > { %v1247_v25 = vmul.f32 %v2123_v21, %v2117_v6 }
 0x5e8   : > { %v1417_v18 = vpop.xlane.xlu1 %1416 }
 0x5ec   : > { %v1250_v19 = vpop.permute.xlu1 %1249 }
 0x61d   : > { %v1072_v20 = vpop.xlane.xlu1 %1071 }
 0x61e   : > { %2124 = vrcp.f32 %v1072_v20 }
 0x61f   : > { %2126 = vrcp.f32 %v1417_v18 }
 0x621   : > { %v1422_v29 = vpop.permute.xlu1 %1421 }
 0x628   : > { %v2125_v22 = vpop.eup %2124 }
 0x629   : > { %v1074_v23 = vmul.f32 %v2125_v22, %v2121_v14  ;;  %v2127_v24 = vpop.eup %2126 }
 0x62a   : > { %v1419_v27 = vmul.f32 %v2127_v24, %v2119_v10 }
 0x62b   : > { %v1075_v26 = vadd.f32 %v1074_v23, %v2890_v51  ;;  %1942 = vmatmul.mubr.msk.f32.vlgmr.msra.gmra.mrb[8].mxu1 %vm823_vm2, %v1074_v23 }
 0x62c   : > { %1950 = vmatpush3.msra.mxu1 %v1250_v19  ;;  %1951 = vmatprep.mubr.msk.f32.mxu1 %vm2452_vm0, %v2453_v1 }
 0x62d   : > { %v1248_v28 = vadd.f32 %v1247_v25, %v1075_v26  ;;  %1959 = vmatprep.subr.mxu1 %v2453_v1 }
 0x62f   : > { %1952 = vmatmul.mubr.msk.f32.vlgmr.msra.gmra.mrb[10].mxu1 %vm823_vm2, %v1247_v25  ;;  %v1420_v30 = vadd.f32 %v1419_v27, %v1248_v28 }
 0x630   : > { %1960 = vmatpush3.msra.mxu1 %v1422_v29  ;;  %1961 = vmatprep.mubr.msk.f32.mxu1 %vm2452_vm0, %v2453_v1  ;;  %v1506_v1 = vld [vmem:[%s3105_s10 + $0x10] sm:$0xff] }
 0x631   : > { %v1589_v31 = vmul.f32 0.25, %v1420_v30  ;;  %v1997_v36 = vpack.c.bf16 %v1507_v35, %v1506_v1 }
 0x633   : > { %1962 = vmatmul.mubr.msk.f32.vlgmr.msra.gmra.mrb[12].mxu1 %vm823_vm2, %v1419_v27  ;;  %1590 = vst.msk [vmem:[%s566_s19] sm:$0xff] %vm823_vm2, %v1589_v31  ;;  %1998 = vmatpush3.bf16.msra.mxu0 %v1997_v36 }
 0x6fe   : > { %v1149_v37 = vpop.f32.mrb[8].mxu1 }
 0x6ff   : > { %1154 = vrot.lane.b32.xlu0 %v1149_v37, %s2457_s16  ;;  %v1943_v38 = vpop.f32.mrb[9].mxu1 }
 0x702   : > { %v1321_v39 = vpop.f32.mrb[10].mxu1 }
 0x703   : > { %1326 = vrot.lane.b32.xlu1 %v1321_v39, %s2458_s17  ;;  %v1953_v40 = vpop.f32.mrb[11].mxu1 }
 0x706   : > { %v1493_v41 = vpop.f32.mrb[12].mxu1 }
 0x707   : > { %1498 = vrot.lane.b32.xlu0 %v1493_v41, %s2459_s9  ;;  %v1963_v42 = vpop.f32.mrb[13].mxu1 }
 0x771   : > { %v1155_v43 = vpop.permute.xlu0 %1154 }
 0x772   : > { %1158 = vst.msk [vmem:[#allocation2] sm:$0xff] %vm1157_vm3, %v1155_v43 }
 0x775   : > { %v1327_v0 = vpop.permute.xlu1 %1326 }
 0x776   : > { %1330 = vst.msk [vmem:[#allocation2] sm:$0xff] %vm1329_vm4, %v1327_v0 }
 0x779   : > { %v1499_v44 = vpop.permute.xlu0 %1498 }
 0x77a   : > { %1502 = vst.msk [vmem:[#allocation2] sm:$0xff] %vm1501_vm5, %v1499_v44 }
 0x781   : > { %v1503_v45 = vld [vmem:[#allocation2] sm:$0xff] }
 0x782   : > { %1973 = vmatmul.mubr.msk.f32.vlgmr.msra.gmra.mrb[8].mxu0 %vm581_vm1, %v1503_v45 }
 0x783   : > { %2343 = shalt.err (!%p2340_p4)
}
 0x784   : > { %s2344_s19 = scalar_lea.hbm %s2951_s12, 128  ;;  %s2348_s6 = scalar_lea.hbm %s3107_s5, 256 }
 0x785   : > { %p2345_p10 = scmp.ne.s32.totalorder %s2951_s12, %s2344_s19  ;;  %p2349_p12 = scmp.lt.u32.totalorder %s2951_s12, %s3107_s5 }
 0x786   : > { %p2350_p0 = scmp.lt.u32.totalorder %s2348_s6, %s2344_s19  ;;  %p2352_p9 = scmp.lt.u32.totalorder %s2344_s19, %s2951_s12 }
 0x787   : > { %p2346_p3 = pnand %p2345_p10, %p3108_p13 }
 0x788   : > { %p2351_p7 = por %p2350_p0, %p2349_p12 }
 0x789   : > { %p2347_p8 = pneg %p2346_p3 }
 0x78a   : > { %p2353_p11 = por %p2352_p9, %p2351_p7 }
 0x78c   : > { %p2354_p1 = pnand %p2353_p11, %p2347_p8 }
 0x78e   : > { %2357 = shalt.err (!%p2354_p1)
}
 0x78f   : > { %2022 = dma.vmem_to_hbm [thread:$0]  (%p3108_p13), %s1624_s30, 128, %s2951_s12, %s1597_s21  }
 0x790   : > { %s3109_s13 = sld [smem:[#allocation35_spill]]  ;;  %s559_s18 = scalar_lea.vmem [#allocation15], %s2810_s29 }
 0x791   : > { %s1610_s24 = sshll.u32 %s559_s18, 4  ;;  %s3110_s20 = sld [smem:[#allocation36_spill]]  ;;  %s2984_s24 = int_to_ptr.vmem [resolvable:$true] %s1610_s24 }
 0x792   : > { %s1592_s12 = scalar_lea.sflag [#allocation5], %s2807_s14  ;;  %s2358_s30 = scalar_lea.vmem %s2984_s24, 128 }
 0x793   : > { %p2359_p6 = scmp.ne.s32.totalorder %s2984_s24, %s2358_s30  ;;  %s2461_s29 = smov [#allocation15]  }
 0x794   : > { %s2362_s27 = sshll.u32 %s2461_s29, 4  ;;  %s2363_s27 = int_to_ptr.vmem [resolvable:$false] %s2362_s27 }
 0x795   : > { %p2360_p5 = pnand %p2359_p6, %p3108_p13  ;;  %s2364_s21 = scalar_lea.vmem %s2363_s27, 256 }
 0x796   : > { %v1847_v46 = vld [vmem:[%s3109_s13] ss:$0 sm:$0xff]  ;;  %p2365_p4 = scmp.lt.s32.totalorder %s2984_s24, %s2363_s27  ;;  %p2366_p10 = scmp.lt.s32.totalorder %s2364_s21, %s2358_s30 }
 0x797   : > { %s2982_s19 = scalar_lea.hbm %s3110_s20, %s1851_s15  ;;  %p2361_p2 = pneg %p2360_p5 }
 0x798   : > { %p2367_p3 = por %p2366_p10, %p2365_p4 }
 0x79a   : > { %p2368_p8 = pnand %p2367_p3, %p2361_p2 }
 0x855   : > { %v1584_v47 = vpop.f32.mrb[8].mxu0 }
 0x856   : > { %v1585_v48 = vadd.f32 %v1847_v46, %v1584_v47  ;;  %v1974_v49 = vpop.f32.mrb[9].mxu0 }
 0x858   : > { %1588 = vst.msk [vmem:[%s559_s18] sm:$0xff] %vm581_vm1, %v1585_v48 }
 0x859   : > { %2371 = shalt.err (!%p2368_p8)
}
 0x85a   : > { %s2372_s14 = scalar_lea.hbm %s2982_s19, 128  ;;  %s2376_s3 = scalar_lea.hbm %s3110_s20, 256 }
 0x85b   : > { %p2373_p12 = scmp.ne.s32.totalorder %s2982_s19, %s2372_s14  ;;  %p2377_p9 = scmp.lt.u32.totalorder %s2982_s19, %s3110_s20 }
 0x85c   : > { %p2378_p11 = scmp.lt.u32.totalorder %s2376_s3, %s2372_s14  ;;  %p2380_p6 = scmp.lt.u32.totalorder %s2372_s14, %s2982_s19 }
 0x85d   : > { %p2374_p0 = pnand %p2373_p12, %p3108_p13 }
 0x85e   : > { %p2379_p1 = por %p2378_p11, %p2377_p9 }
 0x85f   : > { %p2375_p7 = pneg %p2374_p0 }
 0x860   : > { %p2381_p5 = por %p2380_p6, %p2379_p1 }
 0x862   : > { %p2382_p2 = pnand %p2381_p5, %p2375_p7 }
 0x864   : > { %2385 = shalt.err (!%p2382_p2)
}
 0x865   : > { %2021 = dma.vmem_to_hbm [thread:$0]  (%p3108_p13), %s2984_s24, 128, %s2982_s19, %s1592_s12  }
 0x866 PF: > { %s3111_s16 = sld [smem:[#allocation24_spill]]  ;;  %s3112_s17 = sld [smem:[#allocation29_spill]] }
 0x867   : > { %s3113_s9 = sld [smem:[#allocation25_spill]] }
 0x86c   : > { %s1635_s13 = sand.u32 1, %s3111_s16   ;;  %p3114_p4 = scmp.ne.s32.totalorder %s3112_s17, 0 }
 0x86d   : > { %p3115_p10 = scmp.ge.s32.totalorder %s3113_s9, 2  ;;  %s1636_s18 = scalar_lea.sflag [#allocation5], %s1635_s13 }
 0x86f   : > { %p2049_p3 = pnand %p3115_p10, %p3114_p4 }
 0x871   : > { %2419 = dma.done.wait (!%p2049_p3), %s1636_s18, 128  }
 0x872   : > { %2421 = vsyncadd (!%p2049_p3), %s1636_s18, 4294967168  ;;  %s1645_s26 = scalar_lea.sflag [#allocation17], %s1635_s13 }
 0x873   : > { %2423 = dma.done.wait (!%p2049_p3), %s1645_s26, 128  }
 0x874   : > { %2425 = vsyncadd (!%p2049_p3), %s1645_s26, 4294967168  ;;  %s3116_s24 = sld [smem:[#allocation26_spill]]  ;;  %s3117_s25 = sld [smem:[#allocation27_spill]] }
 0x875   : > { %s3118_s21 = smov %s2432_s22  ;;  %s3119_s22 = smov %s2436_s23 }
 0x87a   : > { %p34_p13 = scmp.ge.s32.totalorder %s3116_s24, 4   ;;  %s3120_s23 = smov %s3117_s25 }
 0x87c   :  { %36 = sbr.rel (!%p34_p13) target bundleno = 20 (0x14), region = 166 }
 0x883   :  { %1650 = vsyncpa [#allocation4], 1 }
 0x884   :  { %1652 = vsyncpa [#allocation4 + $0x1], 1 }
 0x885   :  { %1653 = vsyncpa [#allocation7], 1 }
 0x886   :  { %1655 = vsyncpa [#allocation7 + $0x1], 1 }
 0x887   :  { %1656 = vsyncpa [#allocation10], 1 }
 0x888   :  { %1657 = vsyncpa [#allocation13], 1 }
 0x889   :  { %1658 = vsyncpa [#allocation5], 1 }
 0x88a   :  { %1660 = vsyncpa [#allocation5 + $0x1], 1 }
 0x88b   :  { %1661 = vsyncpa [#allocation17], 1 }
 0x88c   :  { %1663 = vsyncpa [#allocation17 + $0x1], 1 }

// kernel: tpu_custom_call.1
= control target key start
LH: loop header
LB: loop body
LE: loop exit
PB: predicated region body
PF: predicated region fallthrough
CT: control target
= control target key end

     0   :  { %s3027_s0 = inlined_call_operand.hbm [shape: f32[2,8,32], index: 0, kind: input, shape index: {}]   ;;  %s3028_s1 = inlined_call_operand.hbm [shape: f32[2,8,32], index: 1, kind: input, shape index: {}]   ;;  %s3029_s2 = inlined_call_operand.hbm [shape: f32[2,8,32], index: 2, kind: input, shape index: {}]   ;;  %s3030_s3 = inlined_call_operand.hbm [shape: f32[32,32], index: 3, kind: input, shape index: {}]   ;;  %s3031_s4 = inlined_call_operand.hbm [shape: f32[32,32], index: 4, kind: input, shape index: {}]   ;;  %s3032_s5 = inlined_call_operand.hbm [shape: f32[32,32], index: 5, kind: input, shape index: {}]   ;;  %s3033_s6 = inlined_call_operand.vmem [shape: f32[1,32], index: 6, kind: input, shape index: {}]   ;;  %s3034_s7 = inlined_call_operand.vmem [shape: f32[1,32], index: 7, kind: input, shape index: {}]   ;;  %s3035_s8 = inlined_call_operand.hbm [shape: f32[1,32], index: 8, kind: input, shape index: {}]   ;;  %s3036_s9 = inlined_call_operand.vmem [shape: f32[32,32], index: 9, kind: input, shape index: {}]   ;;  %s3037_s10 = inlined_call_operand.vmem [shape: f32[1,32], index: 10, kind: input, shape index: {}]   ;;  %s3038_s11 = inlined_call_operand.hbm [shape: f32[2,8,32], index: 11, kind: output, shape index: {0}]   ;;  %s3039_s12 = inlined_call_operand.hbm [shape: f32[2,8,8], index: 12, kind: output, shape index: {1}]  }
   0x1   :  { %3065 = sst [smem:[#allocation30_spill]] %s3028_s1 }
   0x2   :  { %3066 = sst [smem:[#allocation31_spill]] %s3030_s3 }
   0x3   :  { %3067 = sst [smem:[#allocation32_spill]] %s3032_s5 }
   0x4   :  { %3068 = sst [smem:[#allocation33_spill]] %s3033_s6 }
   0x5   :  { %3069 = sst [smem:[#allocation34_spill]] %s3036_s9 }
   0x6   :  { %3070 = sst [smem:[#allocation35_spill]] %s3037_s10 }
   0x7   :  { %3071 = sst [smem:[#allocation36_spill]] %s3038_s11 }
   0x8   :  { %3072 = sst [smem:[#allocation37_spill]] %s3039_s12 }
   0x9   :  { %18 = vsyncpa [#allocation4], 0 }
   0xa   :  { %20 = vsyncpa [#allocation4 + $0x1], 0 }
   0xb   :  { %21 = vsyncpa [#allocation7], 0 }
   0xc   :  { %23 = vsyncpa [#allocation7 + $0x1], 0 }
   0xd   :  { %24 = vsyncpa [#allocation10], 0 }
   0xe   :  { %25 = vsyncpa [#allocation13], 0 }
   0xf   :  { %26 = vsyncpa [#allocation5], 0 }
  0x10   :  { %28 = vsyncpa [#allocation5 + $0x1], 0 }
  0x11   :  { %29 = vsyncpa [#allocation17], 0 }
  0x12   :  { %31 = vsyncpa [#allocation17 + $0x1], 0  ;;  %s2527_s21 = smov 0   ;;  %s2529_s22 = smov 0  }
  0x13   :  { %s2531_s23 = smov 0   ;;  %s2533_s24 = smov 0  }
  0x14 LB: > { %3073 = sst [smem:[#allocation24_spill]] %s2428_s21  ;;  %s2442_s25 = smov [#allocation9]   ;;  %s2440_s24 = sphi %s2533_s24, %s3116_s24   ;;  %s2436_s23 = sphi %s2531_s23, %s3120_s23   ;;  %s2432_s22 = sphi %s2529_s22, %s3119_s22   ;;  %s2428_s21 = sphi %s2527_s21, %s3118_s21  }
  0x15   : > { %3074 = sst [smem:[#allocation25_spill]] %s2440_s24  ;;  %s352_s26 = sshll.u32 %s2442_s25, 4  ;;  %s2553_s26 = int_to_ptr.vmem [resolvable:$true] %s352_s26 }
  0x16   : > { %s2548_s27 = sadd.s32 4294967295, %s2440_s24   ;;  %p1807_p0 = scmp.ge.s32.totalorder %s2440_s24, 1 }
  0x17   : > { %p3051_p1 = scmp.eq.s32.totalorder %s2548_s27, 0  ;;  %p340_p2 = scmp.lt.s32.totalorder %s2440_s24, 3 }
  0x18   : > { %s2443_s29 = smov [#allocation12]   ;;  %s3077_s3 = sld [smem:[#allocation31_spill]] }
  0x19   : > { %p2555_p3 = pnand %p1807_p0, %p340_p2  ;;  %s378_s30 = sshll.u32 %s2443_s29, 4  ;;  %s2568_s30 = int_to_ptr.vmem [resolvable:$true] %s378_s30 }
  0x1b   : > { %s3075_s28 = scalar_select %p2555_p3, 1, 0 }
  0x1c   : > { %p2025_p5 = pneg %p2555_p3 }
  0x1e   : > { %p2564_p6 = pnand %p2025_p5, %p3051_p1  ;;  %s2128_s16 = scalar_lea.hbm %s3077_s3, 512 }
  0x1f   : > { %p2129_p7 = scmp.ne.s32.totalorder %s3077_s3, %s2128_s16  ;;  %p2135_p11 = scmp.lt.u32.totalorder %s2128_s16, %s3077_s3 }
  0x20   : > { %s3076_s13 = scalar_select %p2564_p6, 1, 0 }
  0x21   : > { %p2578_p8 = pneg %p2564_p6 }
  0x23   : > { %s3078_s19 = scalar_select %p2578_p8, 1, 0 }
  0x24   : > { %p2131_p9 = pnand %p2578_p8, %p2129_p7 }
  0x26   : > { %p2132_p10 = pneg %p2131_p9 }
  0x28   : > { %p2137_p12 = pnand %p2135_p11, %p2132_p10 }
  0x2a   : > { %2140 = shalt.err (!%p2137_p12)
}
  0x2b   : > { %s2141_s29 = scalar_lea.vmem %s2553_s26, 512  ;;  %p2149_p5 = scmp.lt.s32.totalorder %s2553_s26, %s2553_s26 }
  0x2c   : > { %p2142_p13 = scmp.ne.s32.totalorder %s2553_s26, %s2141_s29  ;;  %p2150_p4 = scmp.lt.s32.totalorder %s2141_s29, %s2141_s29 }
  0x2e   : > { %p2144_p0 = pnand %p2142_p13, %p2578_p8  ;;  %p2151_p7 = por %p2150_p4, %p2149_p5 }
  0x30   : > { %p2145_p2 = pneg %p2144_p0 }
  0x32   : > { %p2152_p9 = pnand %p2151_p7, %p2145_p2 }
  0x34   : > { %2155 = shalt.err (!%p2152_p9)
}
  0x35   : > { %s3043_s14 = smov 128   ;;  %s3044_s15 = smov 8  }
  0x36   : > { %2028 = dma.hbm_to_vmem [thread:$0]  (!%p2564_p6), %s3077_s3, 512, %s2553_s26, [#allocation10], %s3043_s14, %s3043_s14, %s3044_s15  }
  0x37   : > { %s3079_s5 = sld [smem:[#allocation32_spill]] }
  0x3d   : > { %s2156_s25 = scalar_lea.hbm %s3079_s5, 512 }
  0x3e   : > { %p2157_p4 = scmp.ne.s32.totalorder %s3079_s5, %s2156_s25  ;;  %p2163_p12 = scmp.lt.u32.totalorder %s2156_s25, %s3079_s5 }
  0x40   : > { %p2159_p10 = pnand %p2157_p4, %p2578_p8 }
  0x42   : > { %p2160_p11 = pneg %p2159_p10 }
  0x44   : > { %p2165_p13 = pnand %p2163_p12, %p2160_p11 }
  0x46   : > { %2168 = shalt.err (!%p2165_p13)
}
  0x47   : > { %s2169_s26 = scalar_lea.vmem %s2568_s30, 512  ;;  %p2177_p7 = scmp.lt.s32.totalorder %s2568_s30, %s2568_s30 }
  0x48   : > { %p2170_p0 = scmp.ne.s32.totalorder %s2568_s30, %s2169_s26  ;;  %p2178_p9 = scmp.lt.s32.totalorder %s2169_s26, %s2169_s26 }
  0x4a   : > { %p2172_p2 = pnand %p2170_p0, %p2578_p8  ;;  %p2179_p4 = por %p2178_p9, %p2177_p7 }
  0x4c   : > { %p2173_p5 = pneg %p2172_p2 }
  0x4e   : > { %p2180_p10 = pnand %p2179_p4, %p2173_p5 }
  0x50   : > { %2183 = shalt.err (!%p2180_p10)
}
  0x51   : > { %2034 = dma.hbm_to_vmem [thread:$0]  (!%p2564_p6), %s3079_s5, 512, %s2568_s30, [#allocation13], %s3043_s14, %s3043_s14, %s3044_s15  }
  0x52   : > { %s1806_s12 = sadd.s32 4294967294, %s2440_s24   ;;  %s2630_s16 = sadd.s32 1, %s2440_s24  }
  0x53   : > { %3080 = sst [smem:[#allocation26_spill]] %s2630_s16  ;;  %s41_s17 = ssub.s32 %s2440_s24, %s2630_s16 }
  0x54   : > { %s44_s18 = sadd.s32 1, %s2436_s23  ;;  %p42_p11 = scmp.eq.s32.totalorder %s41_s17, 0 }
  0x55   : > { %p51_p12 = scmp.ne.s32.totalorder %s2436_s23, %s2432_s22  ;;  %p52_p13 = scmp.eq.s32.totalorder %s2440_s24, 0 }
  0x56   : > { %p57_p0 = scmp.ne.s32.totalorder %s2432_s22, %s2428_s21  ;;  %p301_p7 = scmp.eq.s32.totalorder %s2548_s27, 1 }
  0x57   : > { %s2641_s20 = scalar_select %p42_p11, %s2436_s23, %s44_s18  }
  0x58   : > { %p53_p2 = por %p52_p13, %p51_p12  ;;  %p2645_p5 = por %p3051_p1, %p57_p0 }
  0x59   : > { %3081 = sst [smem:[#allocation27_spill]] %s2641_s20  ;;  %p307_p9 = scmp.eq.s32.totalorder %s1806_s12, 1 }
  0x5a   : > { %s3082_s25 = scalar_select %p2645_p5, 1, 0 }
  0x5b   : > { %p2059_p4 = scmp.lt.s32.totalorder %s2440_s24, 2  ;;  %s3045_s30 = sand.u32 1, %s2436_s23  }
  0x5c   : > { %p2652_p10 = por %p301_p7, %p51_p12  ;;  %p2656_p3 = por %p307_p9, %p57_p0 }
  0x5d   : > { %s2662_s10 = sshll.u32 %s3045_s30, 3  ;;  %s2665_s11 = sshll.u32 %s2440_s24, 7 }
  0x5e   : > { %s3083_s29 = scalar_select %p2652_p10, 1, 0 }
  0x5f   : > { %s3085_s26 = scalar_select %p2656_p3, 1, 0 }
  0x60   : > { %3084 = sst [smem:[#allocation28_spill]] %s3083_s29  ;;  %p2667_p11 = pnand %p2059_p4, %p53_p2 }
  0x61   : > { %3086 = sst [smem:[#allocation29_spill]] %s3085_s26  ;;  %s433_s12 = sand.u32 1, %s2440_s24  }
  0x62   : > { %s3087_s17 = scalar_select %p2667_p11, 1, 0 }
  0x63   : > { %s3088_s1 = sld [smem:[#allocation30_spill]]  ;;  %s437_s30 = scalar_lea.vmem [#allocation6], %s2662_s10 }
  0x64   : > { %s444_s3 = sshll.u32 %s437_s30, 4  ;;  %s2446_s5 = smov [#allocation11]   ;;  %s2679_s3 = int_to_ptr.vmem [resolvable:$true] %s444_s3 }
  0x65   : > { %s2681_s20 = sshll.u32 %s2446_s5, 4  ;;  %s2683_s16 = scalar_lea.sflag [#allocation7], %s433_s12  ;;  %s366_s20 = int_to_ptr.vmem [resolvable:$true] %s2681_s20 }
  0x66   : > { %p2689_p13 = pneg %p2667_p11 }
  0x68   : > { %s3089_s14 = scalar_select %p2689_p13, 1, 0 }
  0x69   : > { %s2676_s15 = scalar_lea.hbm %s3088_s1, %s2665_s11  ;;  %s2189_s24 = scalar_lea.hbm %s3088_s1, 256 }
  0x6a   : > { %s2184_s26 = scalar_lea.hbm %s2676_s15, 128  ;;  %p2190_p7 = scmp.lt.u32.totalorder %s2676_s15, %s3088_s1 }
  0x6b   : > { %p2185_p12 = scmp.ne.s32.totalorder %s2676_s15, %s2184_s26  ;;  %p2191_p9 = scmp.lt.u32.totalorder %s2189_s24, %s2184_s26 }
  0x6c   : > { %p2193_p1 = scmp.lt.u32.totalorder %s2184_s26, %s2676_s15 }
  0x6d   : > { %p2187_p0 = pnand %p2689_p13, %p2185_p12  ;;  %p2192_p4 = por %p2191_p9, %p2190_p7 }
  0x6f   : > { %p2188_p2 = pneg %p2187_p0  ;;  %p2194_p3 = por %p2193_p1, %p2192_p4 }
  0x71   : > { %p2195_p10 = pnand %p2194_p3, %p2188_p2 }
  0x73   : > { %2198 = shalt.err (!%p2195_p10)
}
  0x74   : > { %s2199_s12 = scalar_lea.vmem %s2679_s3, 128  ;;  %s2447_s18 = smov [#allocation6]  }
  0x75   : > { %p2200_p12 = scmp.ne.s32.totalorder %s2679_s3, %s2199_s12  ;;  %s2204_s30 = sshll.u32 %s2447_s18, 4  ;;  %s2205_s30 = int_to_ptr.vmem [resolvable:$false] %s2204_s30 }
  0x76   : > { %s2206_s21 = scalar_lea.vmem %s2205_s30, 256  ;;  %p2207_p6 = scmp.lt.s32.totalorder %s2679_s3, %s2205_s30 }
  0x77   : > { %p2202_p0 = pnand %p2200_p12, %p2689_p13  ;;  %p2208_p8 = scmp.lt.s32.totalorder %s2206_s21, %s2199_s12 }
  0x79   : > { %p2203_p5 = pneg %p2202_p0  ;;  %p2209_p7 = por %p2208_p8, %p2207_p6 }
  0x7b   : > { %p2210_p9 = pnand %p2209_p7, %p2203_p5 }
  0x7d   : > { %2213 = shalt.err (!%p2210_p9)
}
  0x7e   : > { %2044 = dma.hbm_to_vmem [thread:$0]  (!%p2667_p11), %s2676_s15, 128, %s2679_s3, %s2683_s16  }
  0x7f   : > { %s2214_s5 = scalar_lea.hbm %s3031_s4, 512  ;;  %p3090_p3 = scmp.ne.s32.totalorder %s3078_s19, 0 }
  0x80   : > { %p2215_p1 = scmp.ne.s32.totalorder %s3031_s4, %s2214_s5  ;;  %p2221_p5 = scmp.lt.u32.totalorder %s2214_s5, %s3031_s4 }
  0x82   : > { %p2217_p6 = pnand %p2215_p1, %p3090_p3 }
  0x84   : > { %p2218_p8 = pneg %p2217_p6 }
  0x86   : > { %p2223_p10 = pnand %p2221_p5, %p2218_p8 }
  0x88   : > { %2226 = shalt.err (!%p2223_p10)
}
  0x89   : > { %s2227_s21 = scalar_lea.vmem %s366_s20, 512  ;;  %p2235_p0 = scmp.lt.s32.totalorder %s366_s20, %s366_s20 }
  0x8a   : > { %p2228_p2 = scmp.ne.s32.totalorder %s366_s20, %s2227_s21  ;;  %p2236_p7 = scmp.lt.s32.totalorder %s2227_s21, %s2227_s21 }
  0x8c   : > { %p2230_p4 = pnand %p2228_p2, %p3090_p3  ;;  %p2237_p9 = por %p2236_p7, %p2235_p0 }
  0x8e   : > { %p2231_p12 = pneg %p2230_p4 }
  0x90   : > { %p2238_p11 = pnand %p2237_p9, %p2231_p12 }
  0x92   : > { %2241 = shalt.err (!%p2238_p11)
}
  0x93   : > { %p3091_p1 = scmp.ne.s32.totalorder %s3076_s13, 0  ;;  %s3092_s1 = smov 8  }
  0x94   : > { %s3093_s3 = smov 128   ;;  %s2448_s26 = smov [#allocation14]  }
  0x95   : > { %2031 = dma.hbm_to_vmem [thread:$0]  (!%p3091_p1), %s3031_s4, 512, %s366_s20, [#allocation10], %s3093_s3, %s3093_s3, %s3092_s1  }
  0x96   : > { %s398_s5 = sshll.u32 %s2448_s26, 4  ;;  %s2242_s30 = scalar_lea.hbm %s3035_s8, 16  ;;  %s399_s5 = int_to_ptr.vmem [resolvable:$true] %s398_s5 }
  0x97   : > { %p2243_p11 = scmp.ne.s32.totalorder %s3035_s8, %s2242_s30  ;;  %p2249_p5 = scmp.lt.u32.totalorder %s2242_s30, %s3035_s8 }
  0x99   : > { %p2245_p6 = pnand %p2243_p11, %p3090_p3 }
  0x9b   : > { %p2246_p8 = pneg %p2245_p6 }
  0x9d   : > { %p2251_p10 = pnand %p2249_p5, %p2246_p8 }
  0x9f   : > { %2254 = shalt.err (!%p2251_p10)
}
  0xa0   : > { %s2255_s20 = scalar_lea.vmem %s399_s5, 16  ;;  %s2262_s1 = scalar_lea.vmem %s399_s5, 32 }
  0xa1   : > { %p2256_p2 = scmp.ne.s32.totalorder %s399_s5, %s2255_s20  ;;  %p2263_p0 = scmp.lt.s32.totalorder %s399_s5, %s399_s5 }
  0xa2   : > { %p2264_p7 = scmp.lt.s32.totalorder %s2262_s1, %s2255_s20 }
  0xa3   : > { %p2258_p4 = pnand %p2256_p2, %p3090_p3 }
  0xa4   : > { %p2265_p9 = por %p2264_p7, %p2263_p0 }
  0xa5   : > { %p2259_p12 = pneg %p2258_p4 }
  0xa7   : > { %p2266_p13 = pnand %p2265_p9, %p2259_p12 }
  0xa9   : > { %2269 = shalt.err (!%p2266_p13)
}
  0xaa   : > { %2037 = dma.hbm_to_vmem [thread:$0]  (!%p3091_p1), %s3035_s8, 16, %s399_s5, [#allocation13]  }
  0xab   : > { %s2757_s19 = scalar_lea.hbm %s3027_s0, %s2665_s11  ;;  %s419_s15 = scalar_lea.vmem [#allocation3], %s2662_s10 }
  0xac   : > { %s426_s24 = sshll.u32 %s419_s15, 4  ;;  %s3094_s13 = sand.u32 1, %s2436_s23   ;;  %s427_s24 = int_to_ptr.vmem [resolvable:$true] %s426_s24 }
  0xad   : > { %s416_s26 = scalar_lea.sflag [#allocation4], %s3094_s13  ;;  %s2270_s18 = scalar_lea.hbm %s2757_s19, 128 }
  0xae   : > { %p2271_p13 = scmp.ne.s32.totalorder %s2757_s19, %s2270_s18  ;;  %p3095_p3 = scmp.ne.s32.totalorder %s3089_s14, 0 }
  0xaf   : > { %s2275_s30 = scalar_lea.hbm %s3027_s0, 256  ;;  %p2276_p1 = scmp.lt.u32.totalorder %s2757_s19, %s3027_s0 }
  0xb0   : > { %p2273_p11 = pnand %p2271_p13, %p3095_p3  ;;  %p2277_p8 = scmp.lt.u32.totalorder %s2275_s30, %s2270_s18 }
  0xb1   : > { %p2279_p10 = scmp.lt.u32.totalorder %s2270_s18, %s2757_s19 }
  0xb2   : > { %p2274_p6 = pneg %p2273_p11  ;;  %p2278_p5 = por %p2277_p8, %p2276_p1 }
  0xb4   : > { %p2280_p2 = por %p2279_p10, %p2278_p5 }
  0xb6   : > { %p2281_p4 = pnand %p2280_p2, %p2274_p6 }
  0xb8   : > { %2284 = shalt.err (!%p2281_p4)
}
  0xb9   : > { %s2285_s1 = scalar_lea.vmem %s427_s24, 128  ;;  %s2449_s29 = smov [#allocation3]  }
  0xba   : > { %p2286_p12 = scmp.ne.s32.totalorder %s427_s24, %s2285_s1  ;;  %s2290_s3 = sshll.u32 %s2449_s29, 4  ;;  %s2291_s3 = int_to_ptr.vmem [resolvable:$false] %s2290_s3 }
  0xbb   : > { %s2292_s6 = scalar_lea.vmem %s2291_s3, 256  ;;  %p2293_p9 = scmp.lt.s32.totalorder %s427_s24, %s2291_s3 }
  0xbc   : > { %p2288_p0 = pnand %p2286_p12, %p3095_p3  ;;  %p2294_p13 = scmp.lt.s32.totalorder %s2292_s6, %s2285_s1 }
  0xbe   : > { %p2289_p7 = pneg %p2288_p0  ;;  %p2295_p11 = por %p2294_p13, %p2293_p9 }
  0xc0   : > { %p2296_p1 = pnand %p2295_p11, %p2289_p7 }
  0xc2   : > { %2299 = shalt.err (!%p2296_p1)
}
  0xc3   : > { %p3096_p8 = scmp.ne.s32.totalorder %s3087_s17, 0  ;;  %s2783_s13 = scalar_lea.hbm %s3029_s2, %s2665_s11 }
  0xc4   : > { %s455_s18 = scalar_lea.vmem [#allocation8], %s2662_s10  ;;  %s2300_s12 = scalar_lea.hbm %s2783_s13, 128 }
  0xc5   : > { %2041 = dma.hbm_to_vmem [thread:$0]  (!%p3096_p8), %s2757_s19, 128, %s427_s24, %s416_s26  }
  0xc6   : > { %s462_s5 = sshll.u32 %s455_s18, 4  ;;  %p2301_p6 = scmp.ne.s32.totalorder %s2783_s13, %s2300_s12  ;;  %s463_s5 = int_to_ptr.vmem [resolvable:$true] %s462_s5 }
  0xc7   : > { %s2305_s19 = scalar_lea.hbm %s3029_s2, 256  ;;  %p2306_p2 = scmp.lt.u32.totalorder %s2783_s13, %s3029_s2 }
  0xc8   : > { %p2303_p5 = pnand %p2301_p6, %p3095_p3  ;;  %p2307_p4 = scmp.lt.u32.totalorder %s2305_s19, %s2300_s12 }
  0xc9   : > { %p2309_p0 = scmp.lt.u32.totalorder %s2300_s12, %s2783_s13 }
  0xca   : > { %p2304_p10 = pneg %p2303_p5  ;;  %p2308_p12 = por %p2307_p4, %p2306_p2 }
  0xcc   : > { %p2310_p7 = por %p2309_p0, %p2308_p12 }
  0xce   : > { %p2311_p9 = pnand %p2310_p7, %p2304_p10 }
  0xd0   : > { %2314 = shalt.err (!%p2311_p9)
}
  0xd1   : > { %s2315_s10 = scalar_lea.vmem %s463_s5, 128  ;;  %s2450_s11 = smov [#allocation8]  }
  0xd2   : > { %p2316_p13 = scmp.ne.s32.totalorder %s463_s5, %s2315_s10  ;;  %s2320_s20 = sshll.u32 %s2450_s11, 4  ;;  %s2321_s20 = int_to_ptr.vmem [resolvable:$false] %s2320_s20 }
  0xd3   : > { %s2322_s1 = scalar_lea.vmem %s2321_s20, 256  ;;  %p2323_p6 = scmp.lt.s32.totalorder %s463_s5, %s2321_s20 }
  0xd4   : > { %p2318_p11 = pnand %p2316_p13, %p3095_p3  ;;  %p2324_p5 = scmp.lt.s32.totalorder %s2322_s1, %s2315_s10 }
  0xd6   : > { %p2319_p1 = pneg %p2318_p11  ;;  %p2325_p8 = por %p2324_p5, %p2323_p6 }
  0xd8   : > { %p2326_p2 = pnand %p2325_p8, %p2319_p1 }
  0xda   : > { %2329 = shalt.err (!%p2326_p2)
}
  0xdb   : > { %p3097_p4 = scmp.ne.s32.totalorder %s3087_s17, 0  ;;  %p3098_p10 = scmp.ne.s32.totalorder %s3075_s28, 0 }
  0xdc   : > { %s2807_s14 = sand.u32 (!%p3098_p10), 1, %s2432_s22   ;;  %p3099_p3 = scmp.ne.s32.totalorder (!%p3098_p10), %s3082_s25, 0 }
  0xdd   : > { %2047 = dma.hbm_to_vmem [thread:$0]  (!%p3097_p4), %s2783_s13, 128, %s463_s5, %s2683_s16  }
  0xde   : > { %471 = sbr.rel (%p3098_p10) target bundleno = 2150 (0x866), region = 64  ;;  %s2810_s29 = sshll.u32 (!%p3098_p10), %s2807_s14, 3 }
  0xdf   : > { %s474_s3 = scalar_lea.sflag (!%p3098_p10), [#allocation4], %s2807_s14  ;;  %s477_s6 = scalar_lea.vmem (!%p3098_p10), [#allocation3], %s2810_s29 }
  0xe5   : > { %2403 = dma.done.wait (%p3099_p3), %s474_s3, 128  }
  0xe6   : > { %2405 = vsyncadd (%p3099_p3), %s474_s3, 4294967168  ;;  %s482_s28 = sand.u32 1, %s2548_s27   ;;  %s486_s17 = scalar_lea.vmem [#allocation6], %s2810_s29 }
  0xe7   : > { %s483_s16 = scalar_lea.sflag [#allocation7], %s482_s28 }
  0xe8   : > { %2407 = dma.done.wait (%p3099_p3), %s483_s16, 256  }
  0xe9   : > { %2409 = vsyncadd (%p3099_p3), %s483_s16, 4294967040  ;;  %s495_s9 = scalar_lea.vmem [#allocation8], %s2810_s29  ;;  %p3100_p8 = scmp.eq.s32.totalorder %s2548_s27, 0 }
  0xeb   : > { %2411 = dma.done.wait (%p3100_p8), [#allocation10], 1024   ;;  %p3101_p12 = pmov %p3100_p8 }
  0xec   : > { %p3102_p0 = pmov %p3100_p8 }
  0xed   : > { %2413 = vsyncadd (%p3101_p12), [#allocation10], 4294966272 }
  0xee   : > { %2415 = dma.done.wait (%p3102_p0), [#allocation13], 528   ;;  %p3103_p7 = pmov %p3102_p0 }
  0xef   : > { %v2451_v0 = vmov 0.0|0.0   ;;  %vm2452_vm0 = vmmov 0   ;;  %v2453_v1 = vmov 0.0   ;;  %v655_v2 = vld [vmem:[#allocation11] sm:$0xff]  ;;  %v656_v3 = vld [vmem:[#allocation11 + $0x8] sm:$0xff]  ;;  %v657_v7 = vld [vmem:[#allocation11 + $0x10] sm:$0xff] }
  0xf0   : > { %2417 = vsyncadd (%p3103_p7), [#allocation13], 4294966768  ;;  %1981 = vmatprep.subr.bf16.mxu1 %v2451_v0  ;;  %1975 = vmatprep.subr.bf16.mxu0 %v2451_v0  ;;  %v570_v4 = vld [vmem:[#allocation9] sm:$0xff]  ;;  %v1982_v5 = vpack.c.bf16 %v656_v3, %v655_v2  ;;  %v571_v6 = vld [vmem:[#allocation9 + $0x8] sm:$0xff]  ;;  %vm581_vm1 = vcmask 261120   ;;  %s3104_s5 = sld [smem:[#allocation33_spill]] }
  0xf1   : > { %1910 = vmatprep.mubr.msk.f32.mxu1 %vm2452_vm0, %v2453_v1  ;;  %1899 = vmatprep.mubr.msk.f32.mxu0 %vm2452_vm0, %v2453_v1  ;;  %v658_v8 = vld [vmem:[#allocation11 + $0x18] sm:$0xff]  ;;  %v1976_v9 = vpack.c.bf16 %v571_v6, %v570_v4  ;;  %v572_v10 = vld [vmem:[#allocation9 + $0x10] sm:$0xff]  ;;  %v568_v14 = vld [vmem:[%s486_s17] sm:$0xff]  ;;  %vm823_vm2 = vcmask 64512   ;;  %s2454_s12 = smov 120   ;;  %s2455_s30 = smov 112  }
  0xf2   : > { %v573_v11 = vld [vmem:[#allocation9 + $0x18] sm:$0xff]  ;;  %1983 = vmatpush3.bf16.msra.mxu1 %v1982_v5  ;;  %v1985_v12 = vpack.c.bf16 %v658_v8, %v657_v7  ;;  %v1831_v16 = vld [vmem:[%s3034_s7] ss:$0 sm:$0xff]  ;;  %s2456_s21 = smov 104   ;;  %v739_v24 = vld [vmem:[#allocation12] sm:$0xff]  ;;  %s566_s19 = scalar_lea.vmem [#allocation16], %s2810_s29 }
  0xf3   : > { %1977 = vmatpush3.bf16.msra.mxu0 %v1976_v9  ;;  %1984 = vmatprep.subr.bf16.mxu1 %v2451_v0  ;;  %v1979_v13 = vpack.c.bf16 %v573_v11, %v572_v10  ;;  %v567_v15 = vld [vmem:[%s477_s6] sm:$0xff]  ;;  %v740_v25 = vld [vmem:[#allocation12 + $0x8] sm:$0xff]  ;;  %v1833_v39 = vld [vmem:[#allocation14] ss:$0 sm:$0xff]  ;;  %s3105_s10 = sld [smem:[#allocation34_spill]]  ;;  %s2457_s16 = smov 8  }
  0xf4   : > { %1978 = vmatprep.subr.bf16.mxu0 %v2451_v0  ;;  %v741_v26 = vld [vmem:[#allocation12 + $0x10] sm:$0xff]  ;;  %v1988_v27 = vpack.c.bf16 %v740_v25, %v739_v24  ;;  %v742_v28 = vld [vmem:[#allocation12 + $0x18] sm:$0xff]  ;;  %s2458_s17 = smov 16   ;;  %vm1157_vm3 = vcmask 130112   ;;  %s3106_s25 = sld [smem:[#allocation28_spill]]  ;;  %vm1329_vm4 = vcmask 195712  }
  0xf5   : > { %v1991_v29 = vpack.c.bf16 %v742_v28, %v741_v26  ;;  %v569_v30 = vld [vmem:[%s495_s9] sm:$0xff]  ;;  %s2459_s9 = smov 24   ;;  %vm1501_vm5 = vcmask 261312   ;;  %s1851_s15 = sshll.u32 %s2548_s27, 7 }
  0xf6   : > { %1986 = vmatpush3.bf16.msra.mxu1 %v1985_v12  ;;  %v1829_v17 = vld [vmem:[%s3104_s5] ss:$0 sm:$0xff]  ;;  %s3107_s5 = sld [smem:[#allocation37_spill]]  ;;  %s2460_s26 = smov [#allocation16]  }
  0xf7   : > { %1980 = vmatpush3.bf16.msra.mxu0 %v1979_v13  ;;  %1924 = vmatprep.subr.mxu1 %v2453_v1  ;;  %s2334_s11 = sshll.u32 %s2460_s26, 4  ;;  %s2335_s11 = int_to_ptr.vmem [resolvable:$false] %s2334_s11 }
  0xf8   : > { %1987 = vmatprep.subr.bf16.mxu0 %v2451_v0  ;;  %s2336_s20 = scalar_lea.vmem %s2335_s11, 256 }
  0xf9   : > { %1911 = vmatmul.mubr.msk.f32.vlgmr.msra.gmra.mrb[0].mxu1 %vm581_vm1, %v568_v14 }
  0xfa   : > { %1900 = vmatmul.mubr.msk.f32.vlgmr.msra.gmra.mrb[0].mxu0 %vm581_vm1, %v567_v15  ;;  %1926 = vmatprep.mubr.msk.f32.mxu1 %vm2452_vm0, %v2453_v1  ;;  %p3108_p13 = scmp.ne.s32.totalorder %s3106_s25, 0 }
  0xfb   : > { %1921 = vmatprep.mubr.msk.f32.mxu0 %vm2452_vm0, %v2453_v1  ;;  %1989 = vmatpush3.bf16.msra.mxu0 %v1988_v27 }
  0xfc   : > { %1990 = vmatprep.subr.bf16.mxu0 %v2451_v0 }
  0xff   : > { %1992 = vmatpush3.bf16.msra.mxu0 %v1991_v29 }
 0x100   : > { %1944 = vmatprep.subr.mxu0 %v2453_v1 }
 0x102   : > { %1922 = vmatmul.mubr.msk.f32.vlgmr.msra.gmra.mrb[2].mxu0 %vm581_vm1, %v569_v30 }
 0x103   : > { %1946 = vmatprep.mubr.msk.f32.mxu0 %vm2452_vm0, %v2453_v1 }
 0x1cc   : > { %v735_v18 = vpop.f32.mrb[0].mxu1 }
 0x1cd   : > { %v736_v19 = vadd.f32 %v1831_v16, %v735_v18  ;;  %v1912_v20 = vpop.f32.mrb[1].mxu1  ;;  %v651_v21 = vpop.f32.mrb[0].mxu0 }
 0x1ce   : > { %v652_v22 = vadd.f32 %v1829_v17, %v651_v21  ;;  %v1901_v23 = vpop.f32.mrb[1].mxu0 }
 0x1cf   : > { %988 = vrot.lane.b32.xlu1 %v736_v19, %s2454_s12  ;;  %1925 = vmatpush3.xpose.msk.msra.mxu1 %vm823_vm2, %v736_v19 }
 0x1d0   : > { %1929 = vmatprep.subr.mxu1 %v2453_v1 }
 0x1d2   : > { %1927 = vmatmul.mubr.msk.f32.vlgmr.msra.gmra.mrb[2].mxu1 %vm823_vm2, %v652_v22 }
 0x1d3   : > { %986 = vrot.lane.b32.xlu1 %v652_v22, %s2454_s12  ;;  %1931 = vmatprep.mubr.msk.f32.mxu1 %vm2452_vm0, %v2453_v1 }
 0x1d5   : > { %v819_v40 = vpop.f32.mrb[2].mxu0 }
 0x1d6   : > { %v2878_v41 = vadd.f32 %v1833_v39, %v819_v40  ;;  %v1923_v42 = vpop.f32.mrb[3].mxu0 }
 0x1d7   : > { %1159 = vrot.lane.b32.xlu1 %v652_v22, %s2455_s30 }
 0x1d8   : > { %1930 = vmatpush3.msra.mxu1 %v2878_v41 }
 0x1d9   : > { %1934 = vmatprep.subr.mxu1 %v2453_v1 }
 0x1db   : > { %1333 = vrot.lane.b32.xlu1 %v736_v19, %s2456_s21 }
 0x1df   : > { %1331 = vrot.lane.b32.xlu1 %v652_v22, %s2456_s21 }
 0x241   : > { %v989_v43 = vpop.permute.xlu1 %988 }
 0x245   : > { %v987_v44 = vpop.permute.xlu1 %986 }
 0x249   : > { %v1160_v45 = vpop.permute.xlu1 %1159 }
 0x24d   : > { %v1334_v48 = vpop.permute.xlu1 %1333 }
 0x251   : > { %v1332_v50 = vpop.permute.xlu1 %1331 }
 0x2a5   : > { %v896_v31 = vpop.f32.mrb[2].mxu1 }
 0x2a6   : > { %v1928_v32 = vpop.f32.mrb[3].mxu1  ;;  %v900_v33 = vsel %vm823_vm2, %v896_v31, -inf }
 0x2a7   : > { %901 = vmax.xlane.f32.xlu0 %v900_v33  ;;  %v1504_v32 = vld [vmem:[%s3105_s10] sm:$0xff]  ;;  %v1505_v33 = vld [vmem:[%s3105_s10 + $0x8] sm:$0xff] }
 0x334   : > { %v902_v34 = vpop.xlane.xlu0 %901 }
 0x335   : > { %v903_v35 = vsub.f32 %v896_v31, %v902_v34  ;;  %v1994_v34 = vpack.c.bf16 %v1505_v33, %v1504_v32 }
 0x337   : > { %v904_v36 = vmul.f32 1.442695, %v903_v35  ;;  %v1507_v35 = vld [vmem:[%s3105_s10 + $0x18] sm:$0xff] }
 0x339   : > { %2112 = vpow2.f32 %v904_v36 }
 0x343   : > { %v2113_v37 = vpop.eup %2112 }
 0x344   : > { %v906_v38 = vsel %vm823_vm2, %v2113_v37, 0.0 }
 0x345   : > { %907 = vadd.xlane.f32.xlu0 %v906_v38 }
 0x35b   : > { %1161 = vrot.lane.b32.xlu0 %v736_v19, %s2455_s30 }
 0x3d2   : > { %v908_v46 = vpop.xlane.xlu0 %907 }
 0x3d3   : > { %2114 = vrcp.f32 %v908_v46 }
 0x3d6   : > { %v1162_v47 = vpop.permute.xlu0 %1161 }
 0x3d7   : > { %1945 = vmatpush3.xpose.msk.msra.mxu0 %vm823_vm2, %v1162_v47 }
 0x3d8   : > { %1954 = vmatprep.subr.mxu0 %v2453_v1 }
 0x3da   : > { %1947 = vmatmul.mubr.msk.f32.vlgmr.msra.gmra.mrb[4].mxu0 %vm823_vm2, %v1160_v45 }
 0x3db   : > { %1955 = vmatpush3.xpose.msk.msra.mxu0 %vm823_vm2, %v1334_v48  ;;  %1956 = vmatprep.mubr.msk.f32.mxu0 %vm2452_vm0, %v2453_v1 }
 0x3dc   : > { %1993 = vmatprep.subr.bf16.mxu0 %v2451_v0 }
 0x3dd   : > { %v2115_v49 = vpop.eup %2114 }
 0x3de   : > { %v2890_v51 = vmul.f32 %v2115_v49, %v2113_v37  ;;  %1957 = vmatmul.mubr.msk.f32.vlgmr.msra.gmra.mrb[6].mxu0 %vm823_vm2, %v1332_v50 }
 0x3df   : > { %1972 = vmatprep.mubr.msk.f32.mxu0 %vm2452_vm0, %v2453_v1  ;;  %1995 = vmatpush3.bf16.msra.mxu0 %v1994_v34 }
 0x3e0   : > { %1932 = vmatmul.mubr.msk.f32.vlgmr.msra.gmra.mrb[4].mxu1 %vm823_vm2, %v2890_v51  ;;  %1996 = vmatprep.subr.bf16.mxu0 %v2451_v0 }
 0x3e1   : > { %1935 = vmatpush3.xpose.msk.msra.mxu1 %vm823_vm2, %v989_v43  ;;  %1936 = vmatprep.mubr.msk.f32.mxu1 %vm2452_vm0, %v2453_v1 }
 0x3e2   : > { %1939 = vmatprep.subr.mxu1 %v2453_v1 }
 0x3e4   : > { %1937 = vmatmul.mubr.msk.f32.vlgmr.msra.gmra.mrb[6].mxu1 %vm823_vm2, %v987_v44 }
 0x3e5   : > { %1941 = vmatprep.mubr.msk.f32.mxu1 %vm2452_vm0, %v2453_v1 }
 0x4ad   : > { %v1233_v52 = vpop.f32.mrb[4].mxu0 }
 0x4ae   : > { %v1948_v53 = vpop.f32.mrb[5].mxu0  ;;  %v1237_v54 = vsel %vm823_vm2, %v1233_v52, -inf }
 0x4af   : > { %1238 = vmax.xlane.f32.xlu0 %v1237_v54 }
 0x4b1   : > { %v1405_v55 = vpop.f32.mrb[6].mxu0 }
 0x4b2   : > { %v1958_v56 = vpop.f32.mrb[7].mxu0  ;;  %v1409_v62 = vsel %vm823_vm2, %v1405_v55, -inf }
 0x4b3   : > { %v981_v57 = vpop.f32.mrb[4].mxu1 }
 0x4b4   : > { %985 = vst.msk [vmem:[#allocation2] sm:$0xff] %vm823_vm2, %v981_v57  ;;  %v1933_v58 = vpop.f32.mrb[5].mxu1 }
 0x4b7   : > { %v1060_v59 = vpop.f32.mrb[6].mxu1 }
 0x4b8   : > { %v1938_v60 = vpop.f32.mrb[7].mxu1  ;;  %v1064_v61 = vsel %vm823_vm2, %v1060_v59, -inf }
 0x4b9   : > { %1065 = vmax.xlane.f32.xlu1 %v1064_v61 }
 0x4bd   : > { %1410 = vmax.xlane.f32.xlu1 %v1409_v62 }
 0x53c   : > { %v1239_v63 = vpop.xlane.xlu0 %1238 }
 0x53d   : > { %v1240_v2 = vsub.f32 %v1233_v52, %v1239_v63 }
 0x53f   : > { %v1241_v3 = vmul.f32 1.442695, %v1240_v2 }
 0x541   : > { %2116 = vpow2.f32 %v1241_v3 }
 0x546   : > { %v1066_v4 = vpop.xlane.xlu1 %1065 }
 0x547   : > { %v1067_v12 = vsub.f32 %v1060_v59, %v1066_v4 }
 0x549   : > { %v1068_v13 = vmul.f32 1.442695, %v1067_v12 }
 0x54a   : > { %v1411_v5 = vpop.xlane.xlu1 %1410 }
 0x54b   : > { %v2117_v6 = vpop.eup %2116  ;;  %v1412_v7 = vsub.f32 %v1405_v55, %v1411_v5 }
 0x54c   : > { %v1243_v8 = vsel %vm823_vm2, %v2117_v6, 0.0 }
 0x54d   : > { %v1413_v9 = vmul.f32 1.442695, %v1412_v7  ;;  %1244 = vadd.xlane.f32.xlu0 %v1243_v8 }
 0x54f   : > { %2118 = vpow2.f32 %v1413_v9 }
 0x550   : > { %2120 = vpow2.f32 %v1068_v13 }
 0x559   : > { %v2119_v10 = vpop.eup %2118 }
 0x55a   : > { %v1415_v11 = vsel %vm823_vm2, %v2119_v10, 0.0  ;;  %v2121_v14 = vpop.eup %2120 }
 0x55b   : > { %1416 = vadd.xlane.f32.xlu1 %v1415_v11  ;;  %v1070_v15 = vsel %vm823_vm2, %v2121_v14, 0.0 }
 0x563   : > { %1077 = vrot.lane.b32.xlu0 %v2878_v41, %s2454_s12  ;;  %s2951_s12 = scalar_lea.hbm %s3107_s5, %s1851_s15 }
 0x56c   : > { %1249 = vrot.lane.b32.xlu1 %v2878_v41, %s2455_s30  ;;  %s1623_s30 = sshll.u32 %s566_s19, 4  ;;  %s1624_s30 = int_to_ptr.vmem [resolvable:$true] %s1623_s30 }
 0x56d   : > { %s2330_s24 = scalar_lea.vmem %s1624_s30, 128  ;;  %p2337_p6 = scmp.lt.s32.totalorder %s1624_s30, %s2335_s11 }
 0x56e   : > { %p2331_p9 = scmp.ne.s32.totalorder %s1624_s30, %s2330_s24  ;;  %p2338_p5 = scmp.lt.s32.totalorder %s2336_s20, %s2330_s24 }
 0x570   : > { %p2332_p11 = pnand %p2331_p9, %p3108_p13  ;;  %p2339_p2 = por %p2338_p5, %p2337_p6 }
 0x572   : > { %p2333_p1 = pneg %p2332_p11 }
 0x574   : > { %p2340_p4 = pnand %p2339_p2, %p2333_p1 }
 0x590   : > { %1071 = vadd.xlane.f32.xlu1 %v1070_v15 }
 0x5a1   : > { %1421 = vrot.lane.b32.xlu1 %v2878_v41, %s2456_s21  ;;  %s1597_s21 = scalar_lea.sflag [#allocation17], %s2807_s14 }
 0x5da   : > { %v1245_v16 = vpop.xlane.xlu0 %1244 }
 0x5db   : > { %2122 = vrcp.f32 %v1245_v16 }
 0x5de   : > { %v1078_v17 = vpop.permute.xlu0 %1077 }
 0x5df   : > { %1940 = vmatpush3.msra.mxu1 %v1078_v17 }
 0x5e0   : > { %1949 = vmatprep.subr.mxu1 %v2453_v1 }
 0x5e5   : > { %v2123_v21 = vpop.eup %2122 }
 0x5e6   : > { %v1247_v25 = vmul.f32 %v2123_v21, %v2117_v6 }
 0x5e8   : > { %v1417_v18 = vpop.xlane.xlu1 %1416 }
 0x5ec   : > { %v1250_v19 = vpop.permute.xlu1 %1249 }
 0x61d   : > { %v1072_v20 = vpop.xlane.xlu1 %1071 }
 0x61e   : > { %2124 = vrcp.f32 %v1072_v20 }
 0x61f   : > { %2126 = vrcp.f32 %v1417_v18 }
 0x621   : > { %v1422_v29 = vpop.permute.xlu1 %1421 }
 0x628   : > { %v2125_v22 = vpop.eup %2124 }
 0x629   : > { %v1074_v23 = vmul.f32 %v2125_v22, %v2121_v14  ;;  %v2127_v24 = vpop.eup %2126 }
 0x62a   : > { %v1419_v27 = vmul.f32 %v2127_v24, %v2119_v10 }
 0x62b   : > { %v1075_v26 = vadd.f32 %v1074_v23, %v2890_v51  ;;  %1942 = vmatmul.mubr.msk.f32.vlgmr.msra.gmra.mrb[8].mxu1 %vm823_vm2, %v1074_v23 }
 0x62c   : > { %1950 = vmatpush3.msra.mxu1 %v1250_v19  ;;  %1951 = vmatprep.mubr.msk.f32.mxu1 %vm2452_vm0, %v2453_v1 }
 0x62d   : > { %v1248_v28 = vadd.f32 %v1247_v25, %v1075_v26  ;;  %1959 = vmatprep.subr.mxu1 %v2453_v1 }
 0x62f   : > { %1952 = vmatmul.mubr.msk.f32.vlgmr.msra.gmra.mrb[10].mxu1 %vm823_vm2, %v1247_v25  ;;  %v1420_v30 = vadd.f32 %v1419_v27, %v1248_v28 }
 0x630   : > { %1960 = vmatpush3.msra.mxu1 %v1422_v29  ;;  %1961 = vmatprep.mubr.msk.f32.mxu1 %vm2452_vm0, %v2453_v1  ;;  %v1506_v1 = vld [vmem:[%s3105_s10 + $0x10] sm:$0xff] }
 0x631   : > { %v1589_v31 = vmul.f32 0.25, %v1420_v30  ;;  %v1997_v36 = vpack.c.bf16 %v1507_v35, %v1506_v1 }
 0x633   : > { %1962 = vmatmul.mubr.msk.f32.vlgmr.msra.gmra.mrb[12].mxu1 %vm823_vm2, %v1419_v27  ;;  %1590 = vst.msk [vmem:[%s566_s19] sm:$0xff] %vm823_vm2, %v1589_v31  ;;  %1998 = vmatpush3.bf16.msra.mxu0 %v1997_v36 }
 0x6fe   : > { %v1149_v37 = vpop.f32.mrb[8].mxu1 }
 0x6ff   : > { %1154 = vrot.lane.b32.xlu0 %v1149_v37, %s2457_s16  ;;  %v1943_v38 = vpop.f32.mrb[9].mxu1 }
 0x702   : > { %v1321_v39 = vpop.f32.mrb[10].mxu1 }
 0x703   : > { %1326 = vrot.lane.b32.xlu1 %v1321_v39, %s2458_s17  ;;  %v1953_v40 = vpop.f32.mrb[11].mxu1 }
 0x706   : > { %v1493_v41 = vpop.f32.mrb[12].mxu1 }
 0x707   : > { %1498 = vrot.lane.b32.xlu0 %v1493_v41, %s2459_s9  ;;  %v1963_v42 = vpop.f32.mrb[13].mxu1 }
 0x771   : > { %v1155_v43 = vpop.permute.xlu0 %1154 }
 0x772   : > { %1158 = vst.msk [vmem:[#allocation2] sm:$0xff] %vm1157_vm3, %v1155_v43 }
 0x775   : > { %v1327_v0 = vpop.permute.xlu1 %1326 }
 0x776   : > { %1330 = vst.msk [vmem:[#allocation2] sm:$0xff] %vm1329_vm4, %v1327_v0 }
 0x779   : > { %v1499_v44 = vpop.permute.xlu0 %1498 }
 0x77a   : > { %1502 = vst.msk [vmem:[#allocation2] sm:$0xff] %vm1501_vm5, %v1499_v44 }
 0x781   : > { %v1503_v45 = vld [vmem:[#allocation2] sm:$0xff] }
 0x782   : > { %1973 = vmatmul.mubr.msk.f32.vlgmr.msra.gmra.mrb[8].mxu0 %vm581_vm1, %v1503_v45 }
 0x783   : > { %2343 = shalt.err (!%p2340_p4)
}
 0x784   : > { %s2344_s19 = scalar_lea.hbm %s2951_s12, 128  ;;  %s2348_s6 = scalar_lea.hbm %s3107_s5, 256 }
 0x785   : > { %p2345_p10 = scmp.ne.s32.totalorder %s2951_s12, %s2344_s19  ;;  %p2349_p12 = scmp.lt.u32.totalorder %s2951_s12, %s3107_s5 }
 0x786   : > { %p2350_p0 = scmp.lt.u32.totalorder %s2348_s6, %s2344_s19  ;;  %p2352_p9 = scmp.lt.u32.totalorder %s2344_s19, %s2951_s12 }
 0x787   : > { %p2346_p3 = pnand %p2345_p10, %p3108_p13 }
 0x788   : > { %p2351_p7 = por %p2350_p0, %p2349_p12 }
 0x789   : > { %p2347_p8 = pneg %p2346_p3 }
 0x78a   : > { %p2353_p11 = por %p2352_p9, %p2351_p7 }
 0x78c   : > { %p2354_p1 = pnand %p2353_p11, %p2347_p8 }
 0x78e   : > { %2357 = shalt.err (!%p2354_p1)
}
 0x78f   : > { %2022 = dma.vmem_to_hbm [thread:$0]  (%p3108_p13), %s1624_s30, 128, %s2951_s12, %s1597_s21  }
 0x790   : > { %s3109_s13 = sld [smem:[#allocation35_spill]]  ;;  %s559_s18 = scalar_lea.vmem [#allocation15], %s2810_s29 }
 0x791   : > { %s1610_s24 = sshll.u32 %s559_s18, 4  ;;  %s3110_s20 = sld [smem:[#allocation36_spill]]  ;;  %s2984_s24 = int_to_ptr.vmem [resolvable:$true] %s1610_s24 }
 0x792   : > { %s1592_s12 = scalar_lea.sflag [#allocation5], %s2807_s14  ;;  %s2358_s30 = scalar_lea.vmem %s2984_s24, 128 }
 0x793   : > { %p2359_p6 = scmp.ne.s32.totalorder %s2984_s24, %s2358_s30  ;;  %s2461_s29 = smov [#allocation15]  }
 0x794   : > { %s2362_s27 = sshll.u32 %s2461_s29, 4  ;;  %s2363_s27 = int_to_ptr.vmem [resolvable:$false] %s2362_s27 }
 0x795   : > { %p2360_p5 = pnand %p2359_p6, %p3108_p13  ;;  %s2364_s21 = scalar_lea.vmem %s2363_s27, 256 }
 0x796   : > { %v1847_v46 = vld [vmem:[%s3109_s13] ss:$0 sm:$0xff]  ;;  %p2365_p4 = scmp.lt.s32.totalorder %s2984_s24, %s2363_s27  ;;  %p2366_p10 = scmp.lt.s32.totalorder %s2364_s21, %s2358_s30 }
 0x797   : > { %s2982_s19 = scalar_lea.hbm %s3110_s20, %s1851_s15  ;;  %p2361_p2 = pneg %p2360_p5 }
 0x798   : > { %p2367_p3 = por %p2366_p10, %p2365_p4 }
 0x79a   : > { %p2368_p8 = pnand %p2367_p3, %p2361_p2 }
 0x855   : > { %v1584_v47 = vpop.f32.mrb[8].mxu0 }
 0x856   : > { %v1585_v48 = vadd.f32 %v1847_v46, %v1584_v47  ;;  %v1974_v49 = vpop.f32.mrb[9].mxu0 }
 0x858   : > { %1588 = vst.msk [vmem:[%s559_s18] sm:$0xff] %vm581_vm1, %v1585_v48 }
 0x859   : > { %2371 = shalt.err (!%p2368_p8)
}
 0x85a   : > { %s2372_s14 = scalar_lea.hbm %s2982_s19, 128  ;;  %s2376_s3 = scalar_lea.hbm %s3110_s20, 256 }
 0x85b   : > { %p2373_p12 = scmp.ne.s32.totalorder %s2982_s19, %s2372_s14  ;;  %p2377_p9 = scmp.lt.u32.totalorder %s2982_s19, %s3110_s20 }
 0x85c   : > { %p2378_p11 = scmp.lt.u32.totalorder %s2376_s3, %s2372_s14  ;;  %p2380_p6 = scmp.lt.u32.totalorder %s2372_s14, %s2982_s19 }
 0x85d   : > { %p2374_p0 = pnand %p2373_p12, %p3108_p13 }
 0x85e   : > { %p2379_p1 = por %p2378_p11, %p2377_p9 }
 0x85f   : > { %p2375_p7 = pneg %p2374_p0 }
 0x860   : > { %p2381_p5 = por %p2380_p6, %p2379_p1 }
 0x862   : > { %p2382_p2 = pnand %p2381_p5, %p2375_p7 }
 0x864   : > { %2385 = shalt.err (!%p2382_p2)
}
 0x865   : > { %2021 = dma.vmem_to_hbm [thread:$0]  (%p3108_p13), %s2984_s24, 128, %s2982_s19, %s1592_s12  }
 0x866 PF: > { %s3111_s16 = sld [smem:[#allocation24_spill]]  ;;  %s3112_s17 = sld [smem:[#allocation29_spill]] }
 0x867   : > { %s3113_s9 = sld [smem:[#allocation25_spill]] }
 0x86c   : > { %s1635_s13 = sand.u32 1, %s3111_s16   ;;  %p3114_p4 = scmp.ne.s32.totalorder %s3112_s17, 0 }
 0x86d   : > { %p3115_p10 = scmp.ge.s32.totalorder %s3113_s9, 2  ;;  %s1636_s18 = scalar_lea.sflag [#allocation5], %s1635_s13 }
 0x86f   : > { %p2049_p3 = pnand %p3115_p10, %p3114_p4 }
 0x871   : > { %2419 = dma.done.wait (!%p2049_p3), %s1636_s18, 128  }
 0x872   : > { %2421 = vsyncadd (!%p2049_p3), %s1636_s18, 4294967168  ;;  %s1645_s26 = scalar_lea.sflag [#allocation17], %s1635_s13 }
 0x873   : > { %2423 = dma.done.wait (!%p2049_p3), %s1645_s26, 128  }
 0x874   : > { %2425 = vsyncadd (!%p2049_p3), %s1645_s26, 4294967168  ;;  %s3116_s24 = sld [smem:[#allocation26_spill]]  ;;  %s3117_s25 = sld [smem:[#allocation27_spill]] }
 0x875   : > { %s3118_s21 = smov %s2432_s22  ;;  %s3119_s22 = smov %s2436_s23 }
 0x87a   : > { %p34_p13 = scmp.ge.s32.totalorder %s3116_s24, 4   ;;  %s3120_s23 = smov %s3117_s25 }
 0x87c   :  { %36 = sbr.rel (!%p34_p13) target bundleno = 20 (0x14), region = 166 }
 0x883   :  { %1650 = vsyncpa [#allocation4], 1 }
 0x884   :  { %1652 = vsyncpa [#allocation4 + $0x1], 1 }
 0x885   :  { %1653 = vsyncpa [#allocation7], 1 }
 0x886   :  { %1655 = vsyncpa [#allocation7 + $0x1], 1 }
 0x887   :  { %1656 = vsyncpa [#allocation10], 1 }
 0x888   :  { %1657 = vsyncpa [#allocation13], 1 }
 0x889   :  { %1658 = vsyncpa [#allocation5], 1 }
 0x88a   :  { %1660 = vsyncpa [#allocation5 + $0x1], 1 }
 0x88b   :  { %1661 = vsyncpa [#allocation17], 1 }
 0x88c   :  { %1663 = vsyncpa [#allocation17 + $0x1], 1 }

</bundles_post_ra>
